<compile_context>
chip_gen: v6e
topology: v6e:2x2x1
jax: 0.10.0
libtpu: 0.0.40
codegen_flags: <defaults>
</compile_context>

<pallas_src>
import functools

import jax
import jax.numpy as jnp
from jax.experimental import pallas as pl
from jax.experimental.pallas import tpu as pltpu


def _round_up(x, m):
    return ((x + m - 1) // m) * m


def _mgruf_kernel(H, K, S, T, BB, Op, nt,
                  x_ref,
                  wihr_ref, wihz_ref, wihn_ref,
                  whhr_ref, whhz_ref, whhn_ref,
                  br_ref, bz_ref, bin_ref, bhn_ref,
                  wkh_ref, wout_ref, bout_ref,
                  dec_ref, hfin_ref,
                  gir_ref, giz_ref, gin_ref, hseq_ref, hist_ref):
    ti = pl.program_id(1)
    pad_time = (nt * T != S)

    # init_hidden: zero the K-deep history at the start of each batch block's sweep.
    @pl.when(ti == 0)
    def _():
        hist_ref[...] = jnp.zeros_like(hist_ref)

    # ---- hoisted per-chunk input-gate matmuls (one MXU call per gate per chunk) ---
    x2d = x_ref[...].reshape(T * BB, x_ref.shape[-1])
    gir_ref[...] = (jnp.dot(x2d, wihr_ref[...], preferred_element_type=jnp.float32)
                    + br_ref[...])          # b_ih_r + b_hh_r (folded in wrapper)
    giz_ref[...] = (jnp.dot(x2d, wihz_ref[...], preferred_element_type=jnp.float32)
                    + bz_ref[...])          # b_ih_z + b_hh_z (folded in wrapper)
    gin_ref[...] = (jnp.dot(x2d, wihn_ref[...], preferred_element_type=jnp.float32)
                    + bin_ref[...])

    # ---- loop invariants, loaded / broadcast exactly once per chunk ----
    whh_r = whhr_ref[...]
    whh_z = whhz_ref[...]
    whh_n = whhn_ref[...]
    b_hn = jnp.broadcast_to(bhn_ref[...], (BB, H))
    wkh_rows = [jnp.broadcast_to(wkh_ref[j][None, :], (BB, H)) for j in range(K)]

    # K-deep hidden history carried as a fori_loop carry (vreg-resident in the chunk)
    hist0 = tuple(hist_ref[j] for j in range(K))

    def step(t, hist):
        row = pl.multiple_of(t * BB, BB)          # 8-aligned sublane offset
        h_prev = hist[K - 1]                      # most recent hidden (BB, H)
        gi_r = gir_ref[pl.ds(row, BB), :]
        gi_z = giz_ref[pl.ds(row, BB), :]
        gi_n = gin_ref[pl.ds(row, BB), :]

        # TODO(synk): W_hh could stay staged in the MXU across steps via
        # pltpu.matmul_push_rhs / matmul_acc_lhs / matmul_pop; jnp.dot kept for
        # robustness across chip generations.
        gh_r = jnp.dot(h_prev, whh_r, preferred_element_type=jnp.float32)
        gh_z = jnp.dot(h_prev, whh_z, preferred_element_type=jnp.float32)
        gh_n = jnp.dot(h_prev, whh_n, preferred_element_type=jnp.float32) + b_hn

        r = jax.nn.sigmoid(gi_r + gh_r)
        z = jax.nn.sigmoid(gi_z + gh_z)
        n = jnp.tanh(gi_n + r * gh_n)

        # fractional-differencing memory filter: unrolled FMA accumulation over the
        # K lagged hidden states (no (K,BB,H) temporary).
        mem = wkh_rows[0] * hist[0]
        for j in range(1, K):
            mem = mem + wkh_rows[j] * hist[j]

        # TODO(synk): cells.MGRUFCell source is not provided; a GRU-style update with
        # a subtracted fractional-memory term is assumed (matches the JAX reference).
        h_new = (1.0 - z) * n + z * h_prev - mem

        hseq_ref[pl.ds(row, BB), :] = h_new       # keep for the batched decode

        new_hist = hist[1:] + (h_new,)
        if pad_time:                              # freeze state on padded timesteps
            keep = (ti * T + t) < S
            new_hist = tuple(jnp.where(keep, hn, ho)
                             for hn, ho in zip(new_hist, hist))
        return new_hist

    hist_fin = jax.lax.fori_loop(0, T, step, hist0, unroll=min(T, 8))

    # persist the K-deep history across time chunks (one small store per chunk)
    for j in range(K):
        hist_ref[j] = hist_fin[j]

    # decode = tanh(Linear(dropout(h_t))) for the whole chunk in one lane-dense
    # matmul (eval mode: dropout = identity); Op is a multiple of 128.
    dec = jnp.tanh(jnp.dot(hseq_ref[...], wout_ref[...],
                           preferred_element_type=jnp.float32) + bout_ref[...])
    dec_ref[...] = dec.reshape(T, BB, Op)

    # final hidden history (K most recent states), written exactly once per batch blk
    @pl.when(ti == nt - 1)
    def _():
        hfin_ref[...] = hist_ref[...]


def mrnnf_forward(input_seq, params, *, lag_k, time_chunk=128, max_batch_block=128):
    """input_seq: (B, S, I) batch-first (like the PyTorch module).

    Returns (decode_seq (B, S, O), hidden (lag_k, B, H))."""
    B, S, I = input_seq.shape
    H = params["w_hh"].shape[0]
    O = params["w_out"].shape[1]
    K = lag_k
    f32 = jnp.float32

    # batch padding / batch blocks (parallel grid axis -> megacore split on v7x)
    Bp8 = _round_up(B, 8)
    BB = min(Bp8, max_batch_block)
    Bp = _round_up(Bp8, BB)
    nb = Bp // BB

    # time chunking ("arbitrary" grid axis; bounds VMEM, restores DMA/compute overlap)
    T = min(S, time_chunk)
    Sp = _round_up(S, T)
    nt = Sp // T

    Op = _round_up(max(O, 128), 128)              # lane-dense decode output

    w_ih = params["w_ih"].astype(f32)
    w_hh = params["w_hh"].astype(f32)
    b_ih = params["b_ih"].astype(f32)
    b_hh = params["b_hh"].astype(f32)

    # per-gate split (PyTorch GRU gate order r, z, n) -> no lane slicing in-kernel
    wihr, wihz, wihn = w_ih[:, 0:H], w_ih[:, H:2 * H], w_ih[:, 2 * H:3 * H]
    whhr, whhz, whhn = w_hh[:, 0:H], w_hh[:, H:2 * H], w_hh[:, 2 * H:3 * H]
    # fold r/z components of b_hh into the input-side bias (n-gate b_hh is scaled
    # by r inside the cell, so it must stay separate)
    b_r = (b_ih[0:H] + b_hh[0:H])[None, :]
    b_z = (b_ih[H:2 * H] + b_hh[H:2 * H])[None, :]
    b_in = b_ih[2 * H:3 * H][None, :]
    b_hn = b_hh[2 * H:3 * H][None, :]

    # weights_over_hiddens: cumprod_k (k - d)/(k + 1), flipped (row K-1 = newest lag)
    d = 0.5 * jax.nn.sigmoid(params["mem_para"].astype(f32))
    k_col = jnp.arange(K, dtype=f32)[:, None]
    wkh = (jnp.tile(k_col, (1, H)) - d[None, :]) / (k_col + 1.0)
    wkh = jnp.flip(jnp.cumprod(wkh, axis=0), axis=0)              # (K, H)

    # lane-dense (padded to Op lanes) decode weights
    w_out = jnp.zeros((H, Op), f32).at[:, :O].set(params["w_out"].astype(f32))
    b_out = jnp.zeros((1, Op), f32).at[0, :O].set(params["b_out"].astype(f32))

    # time-major, batch/time zero-padded input: (Sp, Bp, I)
    x_tm = jnp.transpose(input_seq, (1, 0, 2)).astype(f32)
    x_tm = jnp.pad(x_tm, ((0, Sp - S), (0, Bp - B), (0, 0)))

    kernel = functools.partial(_mgruf_kernel, H, K, S, T, BB, Op, nt)
    full2d = lambda bi, ti: (0, 0)

    # VMEM budget derived from the actual per-chunk footprint (not a hard constant);
    # capped at 48 MiB so it also fits v7x's 64 MiB physical VMEM.
    itemsize = 4
    io_bytes = 2 * (T * BB * I + T * BB * Op + K * BB * H) * itemsize
    w_bytes = 2 * (3 * I * H + 3 * H * H + 4 * H + K * H + H * Op + Op) * itemsize
    scratch_bytes = (4 * T * BB * H + K * BB * H) * itemsize
    vmem_limit = int(min(max(2 * (io_bytes + w_bytes + scratch_bytes), 16 << 20),
                         48 << 20))

    dec, hfin = pl.pallas_call(
        kernel,
        out_shape=(jax.ShapeDtypeStruct((Sp, Bp, Op), f32),
                   jax.ShapeDtypeStruct((K, Bp, H), f32)),
        grid_spec=pltpu.PrefetchScalarGridSpec(
            num_scalar_prefetch=0,
            grid=(nb, nt),
            in_specs=[
                pl.BlockSpec((T, BB, I), lambda bi, ti: (ti, bi, 0)),   # x chunk
                pl.BlockSpec((I, H), full2d), pl.BlockSpec((I, H), full2d),
                pl.BlockSpec((I, H), full2d),
                pl.BlockSpec((H, H), full2d), pl.BlockSpec((H, H), full2d),
                pl.BlockSpec((H, H), full2d),
                pl.BlockSpec((1, H), full2d), pl.BlockSpec((1, H), full2d),
                pl.BlockSpec((1, H), full2d), pl.BlockSpec((1, H), full2d),
                pl.BlockSpec((K, H), full2d),
                pl.BlockSpec((H, Op), full2d), pl.BlockSpec((1, Op), full2d),
            ],
            out_specs=[
                pl.BlockSpec((T, BB, Op), lambda bi, ti: (ti, bi, 0)),  # decode chunk
                pl.BlockSpec((K, BB, H), lambda bi, ti: (0, bi, 0)),    # final hidden
            ],
            scratch_shapes=[
                pltpu.VMEM((T * BB, H), f32),   # gi_r (precomputed input gates)
                pltpu.VMEM((T * BB, H), f32),   # gi_z
                pltpu.VMEM((T * BB, H), f32),   # gi_n
                pltpu.VMEM((T * BB, H), f32),   # hidden states of the chunk (decode)
                pltpu.VMEM((K, BB, H), f32),    # K-deep hidden history (cross-chunk)
            ]),
        compiler_params=pltpu.CompilerParams(
            dimension_semantics=("parallel", "arbitrary"),
            vmem_limit_bytes=vmem_limit),
    )(x_tm, wihr, wihz, wihn, whhr, whhz, whhn,
      b_r, b_z, b_in, b_hn, wkh, w_out, b_out)

    decode_seq = jnp.transpose(dec[:S, :B, :O], (1, 0, 2))   # (B, S, O)
    hidden = hfin[:, :B, :]                                  # (K, B, H)
    return decode_seq, hidden


def mrnnf_reference(input_seq, params, *, lag_k):
    """Pure-JAX reference of the same assumed MGRUF math (for sanity checking)."""
    B, S, I = input_seq.shape
    H = params["w_hh"].shape[0]
    hp = jax.lax.Precision.HIGHEST

    d = 0.5 * jax.nn.sigmoid(params["mem_para"])
    k_col = jnp.arange(lag_k, dtype=jnp.float32)[:, None]
    wkh = (jnp.tile(k_col, (1, H)) - d[None, :]) / (k_col + 1.0)
    wkh = jnp.flip(jnp.cumprod(wkh, axis=0), axis=0)

    hist = jnp.zeros((lag_k, B, H), jnp.float32)
    decs = []
    for t in range(S):
        x = input_seq[:, t, :].astype(jnp.float32)
        h_prev = hist[-1]
        gi = jnp.dot(x, params["w_ih"], precision=hp) + params["b_ih"]
        gh = jnp.dot(h_prev, params["w_hh"], precision=hp) + params["b_hh"]
        r = jax.nn.sigmoid(gi[:, :H] + gh[:, :H])
        z = jax.nn.sigmoid(gi[:, H:2 * H] + gh[:, H:2 * H])
        n = jnp.tanh(gi[:, 2 * H:] + r * gh[:, 2 * H:])
        mem = jnp.sum(wkh[:, None, :] * hist, axis=0)
        h_new = (1.0 - z) * n + z * h_prev - mem
        hist = jnp.concatenate([hist[1:], h_new[None]], axis=0)
        decs.append(jnp.tanh(jnp.dot(h_new, params["w_out"], precision=hp)
                             + params["b_out"]))
    return jnp.stack(decs, axis=1), hist


def init_params(key, input_size, hidden_size, output_size):
    """Deterministic parameter init matching the module's parameter shapes."""
    ks = jax.random.split(key, 6)
    scale = 0.1
    return {
        "w_ih": scale * jax.random.normal(ks[0], (input_size, 3 * hidden_size), jnp.float32),
        "w_hh": scale * jax.random.normal(ks[1], (hidden_size, 3 * hidden_size), jnp.float32),
        "b_ih": scale * jax.random.normal(ks[2], (3 * hidden_size,), jnp.float32),
        "b_hh": scale * jax.random.normal(ks[3], (3 * hidden_size,), jnp.float32),
        "mem_para": jnp.zeros((hidden_size,), jnp.float32),      # init_mem_para default
        "w_out": scale * jax.random.normal(ks[4], (hidden_size, output_size), jnp.float32),
        "b_out": scale * jax.random.normal(ks[5], (output_size,), jnp.float32),
    }


if __name__ == "__main__":
    B, S, I, H, O, K = 2, 8, 4, 32, 4, 5

    key = jax.random.PRNGKey(0)
    k_x, k_p = jax.random.split(key)
    x = jax.random.normal(k_x, (B, S, I), jnp.float32)
    params = init_params(k_p, I, H, O)

    fwd = jax.jit(functools.partial(mrnnf_forward, lag_k=K))
    decode_seq, hidden = fwd(x, params)
    jax.block_until_ready((decode_seq, hidden))

    assert decode_seq.shape == (B, S, O)
    assert hidden.shape == (K, B, H)
    assert bool(jnp.all(jnp.isfinite(decode_seq)))
    assert bool(jnp.all(jnp.isfinite(hidden)))

    # sanity check against a pure-JAX implementation of the same recurrence
    ref_dec, ref_hid = jax.jit(functools.partial(mrnnf_reference, lag_k=K))(x, params)
    jax.block_until_ready((ref_dec, ref_hid))
    assert bool(jnp.allclose(decode_seq, ref_dec, atol=1e-2, rtol=1e-2))
    assert bool(jnp.allclose(hidden, ref_hid, atol=1e-2, rtol=1e-2))

    print("KERNEL_OK")
</pallas_src>

<mosaic_0001>
module attributes {stable_mosaic.version = 11 : i64} {
  func.func @_mgruf_kernel(%arg0: i32, %arg1: i32, %arg2: memref<8x8x4xf32, #tpu.memory_space<vmem>>, %arg3: memref<4x32xf32, #tpu.memory_space<vmem>>, %arg4: memref<4x32xf32, #tpu.memory_space<vmem>>, %arg5: memref<4x32xf32, #tpu.memory_space<vmem>>, %arg6: memref<32x32xf32, #tpu.memory_space<vmem>>, %arg7: memref<32x32xf32, #tpu.memory_space<vmem>>, %arg8: memref<32x32xf32, #tpu.memory_space<vmem>>, %arg9: memref<1x32xf32, #tpu.memory_space<vmem>>, %arg10: memref<1x32xf32, #tpu.memory_space<vmem>>, %arg11: memref<1x32xf32, #tpu.memory_space<vmem>>, %arg12: memref<1x32xf32, #tpu.memory_space<vmem>>, %arg13: memref<5x32xf32, #tpu.memory_space<vmem>>, %arg14: memref<32x128xf32, #tpu.memory_space<vmem>>, %arg15: memref<1x128xf32, #tpu.memory_space<vmem>>, %arg16: memref<8x8x128xf32, #tpu.memory_space<vmem>>, %arg17: memref<5x8x32xf32, #tpu.memory_space<vmem>>, %arg18: memref<64x32xf32, #tpu.memory_space<vmem>>, %arg19: memref<64x32xf32, #tpu.memory_space<vmem>>, %arg20: memref<64x32xf32, #tpu.memory_space<vmem>>, %arg21: memref<64x32xf32, #tpu.memory_space<vmem>>, %arg22: memref<5x8x32xf32, #tpu.memory_space<vmem>>) attributes {dimension_semantics = [#tpu.dimension_semantics<parallel>, #tpu.dimension_semantics<arbitrary>], iteration_bounds = array<i64: 1, 1>, scalar_prefetch = 0 : i64, scratch_operands = 5 : i64, tpu.core_type = #tpu.core_type<tc>, window_params = [{transform_indices = @transform_0, window_bounds = array<i64: 8, 8, 4>}, {pipeline_mode = #tpu.pipeline_mode<synchronous>, transform_indices = @transform_1, window_bounds = array<i64: 4, 32>}, {pipeline_mode = #tpu.pipeline_mode<synchronous>, transform_indices = @transform_2, window_bounds = array<i64: 4, 32>}, {pipeline_mode = #tpu.pipeline_mode<synchronous>, transform_indices = @transform_3, window_bounds = array<i64: 4, 32>}, {pipeline_mode = #tpu.pipeline_mode<synchronous>, transform_indices = @transform_4, window_bounds = array<i64: 32, 32>}, {pipeline_mode = #tpu.pipeline_mode<synchronous>, transform_indices = @transform_5, window_bounds = array<i64: 32, 32>}, {pipeline_mode = #tpu.pipeline_mode<synchronous>, transform_indices = @transform_6, window_bounds = array<i64: 32, 32>}, {pipeline_mode = #tpu.pipeline_mode<synchronous>, transform_indices = @transform_7, window_bounds = array<i64: 1, 32>}, {pipeline_mode = #tpu.pipeline_mode<synchronous>, transform_indices = @transform_8, window_bounds = array<i64: 1, 32>}, {pipeline_mode = #tpu.pipeline_mode<synchronous>, transform_indices = @transform_9, window_bounds = array<i64: 1, 32>}, {pipeline_mode = #tpu.pipeline_mode<synchronous>, transform_indices = @transform_10, window_bounds = array<i64: 1, 32>}, {pipeline_mode = #tpu.pipeline_mode<synchronous>, transform_indices = @transform_11, window_bounds = array<i64: 5, 32>}, {pipeline_mode = #tpu.pipeline_mode<synchronous>, transform_indices = @transform_12, window_bounds = array<i64: 32, 128>}, {pipeline_mode = #tpu.pipeline_mode<synchronous>, transform_indices = @transform_13, window_bounds = array<i64: 1, 128>}, {transform_indices = @transform_14, window_bounds = array<i64: 8, 8, 128>}, {transform_indices = @transform_15, window_bounds = array<i64: 5, 8, 32>}]} {
    %c0_i32 = arith.constant 0 : i32
    %0 = arith.cmpi eq, %arg1, %c0_i32 : i32
    %1 = arith.extui %0 : i1 to i32
    %c0_i32_0 = arith.constant 0 : i32
    %2 = arith.cmpi ne, %1, %c0_i32_0 : i32
    scf.if %2 {
      %cst_168 = arith.constant 0.000000e+00 : f32
      %443 = vector.broadcast %cst_168 : f32 to vector<5x8x32xf32>
      %c0_169 = arith.constant 0 : index
      %c0_170 = arith.constant 0 : index
      %c0_171 = arith.constant 0 : index
      %444 = vector.load %arg22[%c0_169, %c0_170, %c0_171] : memref<5x8x32xf32, #tpu.memory_space<vmem>>, vector<5x8x32xf32>
      tpu.vector_store %arg22[%c0_169, %c0_170, %c0_171], %443 {strides = array<i32>} : memref<5x8x32xf32, #tpu.memory_space<vmem>>, vector<5x8x32xf32>,
    } else {
    }
    %c0 = arith.constant 0 : index
    %c0_1 = arith.constant 0 : index
    %c0_2 = arith.constant 0 : index
    %3 = vector.load %arg2[%c0, %c0_1, %c0_2] : memref<8x8x4xf32, #tpu.memory_space<vmem>>, vector<8x8x4xf32>
    %4 = vector.shape_cast %3 : vector<8x8x4xf32> to vector<64x4xf32>
    %c0_3 = arith.constant 0 : index
    %c0_4 = arith.constant 0 : index
    %5 = vector.load %arg3[%c0_3, %c0_4] : memref<4x32xf32, #tpu.memory_space<vmem>>, vector<4x32xf32>
    %cst = arith.constant dense<0.000000e+00> : vector<64x32xf32>
    %6 = tpu.matmul %4, %5, %cst {dimension_numbers = #tpu.dot_dimension_numbers<[1], [0], [0], [1], [0, 0, 1, 1], [], []>} : vector<64x4xf32>, vector<4x32xf32>, vector<64x32xf32> -> vector<64x32xf32>
    %c0_5 = arith.constant 0 : index
    %c0_6 = arith.constant 0 : index
    %7 = vector.load %arg9[%c0_5, %c0_6] : memref<1x32xf32, #tpu.memory_space<vmem>>, vector<1x32xf32>
    %8 = vector.broadcast %7 : vector<1x32xf32> to vector<64x32xf32>
    %9 = arith.addf %6, %8 : vector<64x32xf32>
    %c0_7 = arith.constant 0 : index
    %c0_8 = arith.constant 0 : index
    %10 = vector.load %arg18[%c0_7, %c0_8] : memref<64x32xf32, #tpu.memory_space<vmem>>, vector<64x32xf32>
    tpu.vector_store %arg18[%c0_7, %c0_8], %9 {strides = array<i32>} : memref<64x32xf32, #tpu.memory_space<vmem>>, vector<64x32xf32>,
    %c0_9 = arith.constant 0 : index
    %c0_10 = arith.constant 0 : index
    %11 = vector.load %arg4[%c0_9, %c0_10] : memref<4x32xf32, #tpu.memory_space<vmem>>, vector<4x32xf32>
    %cst_11 = arith.constant dense<0.000000e+00> : vector<64x32xf32>
    %12 = tpu.matmul %4, %11, %cst_11 {dimension_numbers = #tpu.dot_dimension_numbers<[1], [0], [0], [1], [0, 0, 1, 1], [], []>} : vector<64x4xf32>, vector<4x32xf32>, vector<64x32xf32> -> vector<64x32xf32>
    %c0_12 = arith.constant 0 : index
    %c0_13 = arith.constant 0 : index
    %13 = vector.load %arg10[%c0_12, %c0_13] : memref<1x32xf32, #tpu.memory_space<vmem>>, vector<1x32xf32>
    %14 = vector.broadcast %13 : vector<1x32xf32> to vector<64x32xf32>
    %15 = arith.addf %12, %14 : vector<64x32xf32>
    %c0_14 = arith.constant 0 : index
    %c0_15 = arith.constant 0 : index
    %16 = vector.load %arg19[%c0_14, %c0_15] : memref<64x32xf32, #tpu.memory_space<vmem>>, vector<64x32xf32>
    tpu.vector_store %arg19[%c0_14, %c0_15], %15 {strides = array<i32>} : memref<64x32xf32, #tpu.memory_space<vmem>>, vector<64x32xf32>,
    %c0_16 = arith.constant 0 : index
    %c0_17 = arith.constant 0 : index
    %17 = vector.load %arg5[%c0_16, %c0_17] : memref<4x32xf32, #tpu.memory_space<vmem>>, vector<4x32xf32>
    %cst_18 = arith.constant dense<0.000000e+00> : vector<64x32xf32>
    %18 = tpu.matmul %4, %17, %cst_18 {dimension_numbers = #tpu.dot_dimension_numbers<[1], [0], [0], [1], [0, 0, 1, 1], [], []>} : vector<64x4xf32>, vector<4x32xf32>, vector<64x32xf32> -> vector<64x32xf32>
    %c0_19 = arith.constant 0 : index
    %c0_20 = arith.constant 0 : index
    %19 = vector.load %arg11[%c0_19, %c0_20] : memref<1x32xf32, #tpu.memory_space<vmem>>, vector<1x32xf32>
    %20 = vector.broadcast %19 : vector<1x32xf32> to vector<64x32xf32>
    %21 = arith.addf %18, %20 : vector<64x32xf32>
    %c0_21 = arith.constant 0 : index
    %c0_22 = arith.constant 0 : index
    %22 = vector.load %arg20[%c0_21, %c0_22] : memref<64x32xf32, #tpu.memory_space<vmem>>, vector<64x32xf32>
    tpu.vector_store %arg20[%c0_21, %c0_22], %21 {strides = array<i32>} : memref<64x32xf32, #tpu.memory_space<vmem>>, vector<64x32xf32>,
    %c0_23 = arith.constant 0 : index
    %c0_24 = arith.constant 0 : index
    %23 = vector.load %arg6[%c0_23, %c0_24] : memref<32x32xf32, #tpu.memory_space<vmem>>, vector<32x32xf32>
    %c0_25 = arith.constant 0 : index
    %c0_26 = arith.constant 0 : index
    %24 = vector.load %arg7[%c0_25, %c0_26] : memref<32x32xf32, #tpu.memory_space<vmem>>, vector<32x32xf32>
    %c0_27 = arith.constant 0 : index
    %c0_28 = arith.constant 0 : index
    %25 = vector.load %arg8[%c0_27, %c0_28] : memref<32x32xf32, #tpu.memory_space<vmem>>, vector<32x32xf32>
    %c0_29 = arith.constant 0 : index
    %c0_30 = arith.constant 0 : index
    %26 = vector.load %arg12[%c0_29, %c0_30] : memref<1x32xf32, #tpu.memory_space<vmem>>, vector<1x32xf32>
    %27 = vector.shape_cast %26 : vector<1x32xf32> to vector<1x32xf32>
    %28 = vector.broadcast %27 : vector<1x32xf32> to vector<8x32xf32>
    %c0_31 = arith.constant 0 : index
    %c0_32 = arith.constant 0 : index
    %29 = vector.load %arg13[%c0_31, %c0_32] : memref<5x32xf32, #tpu.memory_space<vmem>>, vector<1x32xf32>
    %30 = vector.shape_cast %29 : vector<1x32xf32> to vector<32xf32>
    %31 = vector.shape_cast %30 : vector<32xf32> to vector<1x32xf32>
    %32 = vector.shape_cast %31 : vector<1x32xf32> to vector<1x32xf32>
    %33 = vector.broadcast %32 : vector<1x32xf32> to vector<8x32xf32>
    %c1 = arith.constant 1 : index
    %c0_33 = arith.constant 0 : index
    %34 = vector.load %arg13[%c1, %c0_33] : memref<5x32xf32, #tpu.memory_space<vmem>>, vector<1x32xf32>
    %35 = vector.shape_cast %34 : vector<1x32xf32> to vector<32xf32>
    %36 = vector.shape_cast %35 : vector<32xf32> to vector<1x32xf32>
    %37 = vector.shape_cast %36 : vector<1x32xf32> to vector<1x32xf32>
    %38 = vector.broadcast %37 : vector<1x32xf32> to vector<8x32xf32>
    %c2 = arith.constant 2 : index
    %c0_34 = arith.constant 0 : index
    %39 = vector.load %arg13[%c2, %c0_34] : memref<5x32xf32, #tpu.memory_space<vmem>>, vector<1x32xf32>
    %40 = vector.shape_cast %39 : vector<1x32xf32> to vector<32xf32>
    %41 = vector.shape_cast %40 : vector<32xf32> to vector<1x32xf32>
    %42 = vector.shape_cast %41 : vector<1x32xf32> to vector<1x32xf32>
    %43 = vector.broadcast %42 : vector<1x32xf32> to vector<8x32xf32>
    %c3 = arith.constant 3 : index
    %c0_35 = arith.constant 0 : index
    %44 = vector.load %arg13[%c3, %c0_35] : memref<5x32xf32, #tpu.memory_space<vmem>>, vector<1x32xf32>
    %45 = vector.shape_cast %44 : vector<1x32xf32> to vector<32xf32>
    %46 = vector.shape_cast %45 : vector<32xf32> to vector<1x32xf32>
    %47 = vector.shape_cast %46 : vector<1x32xf32> to vector<1x32xf32>
    %48 = vector.broadcast %47 : vector<1x32xf32> to vector<8x32xf32>
    %c4 = arith.constant 4 : index
    %c0_36 = arith.constant 0 : index
    %49 = vector.load %arg13[%c4, %c0_36] : memref<5x32xf32, #tpu.memory_space<vmem>>, vector<1x32xf32>
    %50 = vector.shape_cast %49 : vector<1x32xf32> to vector<32xf32>
    %51 = vector.shape_cast %50 : vector<32xf32> to vector<1x32xf32>
    %52 = vector.shape_cast %51 : vector<1x32xf32> to vector<1x32xf32>
    %53 = vector.broadcast %52 : vector<1x32xf32> to vector<8x32xf32>
    %c0_37 = arith.constant 0 : index
    %c0_38 = arith.constant 0 : index
    %c0_39 = arith.constant 0 : index
    %54 = vector.load %arg22[%c0_37, %c0_38, %c0_39] : memref<5x8x32xf32, #tpu.memory_space<vmem>>, vector<1x8x32xf32>
    %55 = vector.shape_cast %54 : vector<1x8x32xf32> to vector<8x32xf32>
    %c1_40 = arith.constant 1 : index
    %c0_41 = arith.constant 0 : index
    %c0_42 = arith.constant 0 : index
    %56 = vector.load %arg22[%c1_40, %c0_41, %c0_42] : memref<5x8x32xf32, #tpu.memory_space<vmem>>, vector<1x8x32xf32>
    %57 = vector.shape_cast %56 : vector<1x8x32xf32> to vector<8x32xf32>
    %c2_43 = arith.constant 2 : index
    %c0_44 = arith.constant 0 : index
    %c0_45 = arith.constant 0 : index
    %58 = vector.load %arg22[%c2_43, %c0_44, %c0_45] : memref<5x8x32xf32, #tpu.memory_space<vmem>>, vector<1x8x32xf32>
    %59 = vector.shape_cast %58 : vector<1x8x32xf32> to vector<8x32xf32>
    %c3_46 = arith.constant 3 : index
    %c0_47 = arith.constant 0 : index
    %c0_48 = arith.constant 0 : index
    %60 = vector.load %arg22[%c3_46, %c0_47, %c0_48] : memref<5x8x32xf32, #tpu.memory_space<vmem>>, vector<1x8x32xf32>
    %61 = vector.shape_cast %60 : vector<1x8x32xf32> to vector<8x32xf32>
    %c4_49 = arith.constant 4 : index
    %c0_50 = arith.constant 0 : index
    %c0_51 = arith.constant 0 : index
    %62 = vector.load %arg22[%c4_49, %c0_50, %c0_51] : memref<5x8x32xf32, #tpu.memory_space<vmem>>, vector<1x8x32xf32>
    %63 = vector.shape_cast %62 : vector<1x8x32xf32> to vector<8x32xf32>
    %c0_i32_52 = arith.constant 0 : i32
    %c8_i32 = arith.constant 8 : i32
    %64 = arith.muli %c0_i32_52, %c8_i32 : i32
    %65 = tpu.assume_multiple %64, 8 : i32
    %66 = arith.index_cast %65 : i32 to index
    %c0_53 = arith.constant 0 : index
    %67 = vector.load %arg18[%66, %c0_53] : memref<64x32xf32, #tpu.memory_space<vmem>>, vector<8x32xf32>
    %68 = arith.index_cast %65 : i32 to index
    %c0_54 = arith.constant 0 : index
    %69 = vector.load %arg19[%68, %c0_54] : memref<64x32xf32, #tpu.memory_space<vmem>>, vector<8x32xf32>
    %70 = arith.index_cast %65 : i32 to index
    %c0_55 = arith.constant 0 : index
    %71 = vector.load %arg20[%70, %c0_55] : memref<64x32xf32, #tpu.memory_space<vmem>>, vector<8x32xf32>
    %cst_56 = arith.constant dense<0.000000e+00> : vector<8x32xf32>
    %72 = tpu.matmul %63, %23, %cst_56 {dimension_numbers = #tpu.dot_dimension_numbers<[1], [0], [0], [1], [0, 0, 1, 1], [], []>} : vector<8x32xf32>, vector<32x32xf32>, vector<8x32xf32> -> vector<8x32xf32>
    %cst_57 = arith.constant dense<0.000000e+00> : vector<8x32xf32>
    %73 = tpu.matmul %63, %24, %cst_57 {dimension_numbers = #tpu.dot_dimension_numbers<[1], [0], [0], [1], [0, 0, 1, 1], [], []>} : vector<8x32xf32>, vector<32x32xf32>, vector<8x32xf32> -> vector<8x32xf32>
    %cst_58 = arith.constant dense<0.000000e+00> : vector<8x32xf32>
    %74 = tpu.matmul %63, %25, %cst_58 {dimension_numbers = #tpu.dot_dimension_numbers<[1], [0], [0], [1], [0, 0, 1, 1], [], []>} : vector<8x32xf32>, vector<32x32xf32>, vector<8x32xf32> -> vector<8x32xf32>
    %75 = arith.addf %74, %28 : vector<8x32xf32>
    %76 = arith.addf %67, %72 : vector<8x32xf32>
    %77 = arith.negf %76 : vector<8x32xf32>
    %78 = math.exp %77 : vector<8x32xf32>
    %cst_59 = arith.constant 1.000000e+00 : f32
    %79 = vector.broadcast %cst_59 : f32 to vector<8x32xf32>
    %80 = arith.addf %79, %78 : vector<8x32xf32>
    %81 = arith.divf %79, %80 : vector<8x32xf32>
    %82 = arith.addf %69, %73 : vector<8x32xf32>
    %83 = arith.negf %82 : vector<8x32xf32>
    %84 = math.exp %83 : vector<8x32xf32>
    %cst_60 = arith.constant 1.000000e+00 : f32
    %85 = vector.broadcast %cst_60 : f32 to vector<8x32xf32>
    %86 = arith.addf %85, %84 : vector<8x32xf32>
    %87 = arith.divf %85, %86 : vector<8x32xf32>
    %88 = arith.mulf %81, %75 : vector<8x32xf32>
    %89 = arith.addf %71, %88 : vector<8x32xf32>
    %90 = math.tanh %89 : vector<8x32xf32>
    %91 = arith.mulf %33, %55 : vector<8x32xf32>
    %92 = arith.mulf %38, %57 : vector<8x32xf32>
    %93 = arith.addf %91, %92 : vector<8x32xf32>
    %94 = arith.mulf %43, %59 : vector<8x32xf32>
    %95 = arith.addf %93, %94 : vector<8x32xf32>
    %96 = arith.mulf %48, %61 : vector<8x32xf32>
    %97 = arith.addf %95, %96 : vector<8x32xf32>
    %98 = arith.mulf %53, %63 : vector<8x32xf32>
    %99 = arith.addf %97, %98 : vector<8x32xf32>
    %cst_61 = arith.constant 1.000000e+00 : f32
    %100 = vector.broadcast %cst_61 : f32 to vector<8x32xf32>
    %101 = arith.subf %100, %87 : vector<8x32xf32>
    %102 = arith.mulf %101, %90 : vector<8x32xf32>
    %103 = arith.mulf %87, %63 : vector<8x32xf32>
    %104 = arith.addf %102, %103 : vector<8x32xf32>
    %105 = arith.subf %104, %99 : vector<8x32xf32>
    %106 = arith.index_cast %65 : i32 to index
    %c0_62 = arith.constant 0 : index
    %107 = vector.load %arg21[%106, %c0_62] : memref<64x32xf32, #tpu.memory_space<vmem>>, vector<8x32xf32>
    tpu.vector_store %arg21[%106, %c0_62], %105 {strides = array<i32>} : memref<64x32xf32, #tpu.memory_space<vmem>>, vector<8x32xf32>,
    %c1_i32 = arith.constant 1 : i32
    %c8_i32_63 = arith.constant 8 : i32
    %108 = arith.muli %c1_i32, %c8_i32_63 : i32
    %109 = tpu.assume_multiple %108, 8 : i32
    %110 = arith.index_cast %109 : i32 to index
    %c0_64 = arith.constant 0 : index
    %111 = vector.load %arg18[%110, %c0_64] : memref<64x32xf32, #tpu.memory_space<vmem>>, vector<8x32xf32>
    %112 = arith.index_cast %109 : i32 to index
    %c0_65 = arith.constant 0 : index
    %113 = vector.load %arg19[%112, %c0_65] : memref<64x32xf32, #tpu.memory_space<vmem>>, vector<8x32xf32>
    %114 = arith.index_cast %109 : i32 to index
    %c0_66 = arith.constant 0 : index
    %115 = vector.load %arg20[%114, %c0_66] : memref<64x32xf32, #tpu.memory_space<vmem>>, vector<8x32xf32>
    %cst_67 = arith.constant dense<0.000000e+00> : vector<8x32xf32>
    %116 = tpu.matmul %105, %23, %cst_67 {dimension_numbers = #tpu.dot_dimension_numbers<[1], [0], [0], [1], [0, 0, 1, 1], [], []>} : vector<8x32xf32>, vector<32x32xf32>, vector<8x32xf32> -> vector<8x32xf32>
    %cst_68 = arith.constant dense<0.000000e+00> : vector<8x32xf32>
    %117 = tpu.matmul %105, %24, %cst_68 {dimension_numbers = #tpu.dot_dimension_numbers<[1], [0], [0], [1], [0, 0, 1, 1], [], []>} : vector<8x32xf32>, vector<32x32xf32>, vector<8x32xf32> -> vector<8x32xf32>
    %cst_69 = arith.constant dense<0.000000e+00> : vector<8x32xf32>
    %118 = tpu.matmul %105, %25, %cst_69 {dimension_numbers = #tpu.dot_dimension_numbers<[1], [0], [0], [1], [0, 0, 1, 1], [], []>} : vector<8x32xf32>, vector<32x32xf32>, vector<8x32xf32> -> vector<8x32xf32>
    %119 = arith.addf %118, %28 : vector<8x32xf32>
    %120 = arith.addf %111, %116 : vector<8x32xf32>
    %121 = arith.negf %120 : vector<8x32xf32>
    %122 = math.exp %121 : vector<8x32xf32>
    %cst_70 = arith.constant 1.000000e+00 : f32
    %123 = vector.broadcast %cst_70 : f32 to vector<8x32xf32>
    %124 = arith.addf %123, %122 : vector<8x32xf32>
    %125 = arith.divf %123, %124 : vector<8x32xf32>
    %126 = arith.addf %113, %117 : vector<8x32xf32>
    %127 = arith.negf %126 : vector<8x32xf32>
    %128 = math.exp %127 : vector<8x32xf32>
    %cst_71 = arith.constant 1.000000e+00 : f32
    %129 = vector.broadcast %cst_71 : f32 to vector<8x32xf32>
    %130 = arith.addf %129, %128 : vector<8x32xf32>
    %131 = arith.divf %129, %130 : vector<8x32xf32>
    %132 = arith.mulf %125, %119 : vector<8x32xf32>
    %133 = arith.addf %115, %132 : vector<8x32xf32>
    %134 = math.tanh %133 : vector<8x32xf32>
    %135 = arith.mulf %33, %57 : vector<8x32xf32>
    %136 = arith.mulf %38, %59 : vector<8x32xf32>
    %137 = arith.addf %135, %136 : vector<8x32xf32>
    %138 = arith.mulf %43, %61 : vector<8x32xf32>
    %139 = arith.addf %137, %138 : vector<8x32xf32>
    %140 = arith.mulf %48, %63 : vector<8x32xf32>
    %141 = arith.addf %139, %140 : vector<8x32xf32>
    %142 = arith.mulf %53, %105 : vector<8x32xf32>
    %143 = arith.addf %141, %142 : vector<8x32xf32>
    %cst_72 = arith.constant 1.000000e+00 : f32
    %144 = vector.broadcast %cst_72 : f32 to vector<8x32xf32>
    %145 = arith.subf %144, %131 : vector<8x32xf32>
    %146 = arith.mulf %145, %134 : vector<8x32xf32>
    %147 = arith.mulf %131, %105 : vector<8x32xf32>
    %148 = arith.addf %146, %147 : vector<8x32xf32>
    %149 = arith.subf %148, %143 : vector<8x32xf32>
    %150 = arith.index_cast %109 : i32 to index
    %c0_73 = arith.constant 0 : index
    %151 = vector.load %arg21[%150, %c0_73] : memref<64x32xf32, #tpu.memory_space<vmem>>, vector<8x32xf32>
    tpu.vector_store %arg21[%150, %c0_73], %149 {strides = array<i32>} : memref<64x32xf32, #tpu.memory_space<vmem>>, vector<8x32xf32>,
    %c2_i32 = arith.constant 2 : i32
    %c8_i32_74 = arith.constant 8 : i32
    %152 = arith.muli %c2_i32, %c8_i32_74 : i32
    %153 = tpu.assume_multiple %152, 8 : i32
    %154 = arith.index_cast %153 : i32 to index
    %c0_75 = arith.constant 0 : index
    %155 = vector.load %arg18[%154, %c0_75] : memref<64x32xf32, #tpu.memory_space<vmem>>, vector<8x32xf32>
    %156 = arith.index_cast %153 : i32 to index
    %c0_76 = arith.constant 0 : index
    %157 = vector.load %arg19[%156, %c0_76] : memref<64x32xf32, #tpu.memory_space<vmem>>, vector<8x32xf32>
    %158 = arith.index_cast %153 : i32 to index
    %c0_77 = arith.constant 0 : index
    %159 = vector.load %arg20[%158, %c0_77] : memref<64x32xf32, #tpu.memory_space<vmem>>, vector<8x32xf32>
    %cst_78 = arith.constant dense<0.000000e+00> : vector<8x32xf32>
    %160 = tpu.matmul %149, %23, %cst_78 {dimension_numbers = #tpu.dot_dimension_numbers<[1], [0], [0], [1], [0, 0, 1, 1], [], []>} : vector<8x32xf32>, vector<32x32xf32>, vector<8x32xf32> -> vector<8x32xf32>
    %cst_79 = arith.constant dense<0.000000e+00> : vector<8x32xf32>
    %161 = tpu.matmul %149, %24, %cst_79 {dimension_numbers = #tpu.dot_dimension_numbers<[1], [0], [0], [1], [0, 0, 1, 1], [], []>} : vector<8x32xf32>, vector<32x32xf32>, vector<8x32xf32> -> vector<8x32xf32>
    %cst_80 = arith.constant dense<0.000000e+00> : vector<8x32xf32>
    %162 = tpu.matmul %149, %25, %cst_80 {dimension_numbers = #tpu.dot_dimension_numbers<[1], [0], [0], [1], [0, 0, 1, 1], [], []>} : vector<8x32xf32>, vector<32x32xf32>, vector<8x32xf32> -> vector<8x32xf32>
    %163 = arith.addf %162, %28 : vector<8x32xf32>
    %164 = arith.addf %155, %160 : vector<8x32xf32>
    %165 = arith.negf %164 : vector<8x32xf32>
    %166 = math.exp %165 : vector<8x32xf32>
    %cst_81 = arith.constant 1.000000e+00 : f32
    %167 = vector.broadcast %cst_81 : f32 to vector<8x32xf32>
    %168 = arith.addf %167, %166 : vector<8x32xf32>
    %169 = arith.divf %167, %168 : vector<8x32xf32>
    %170 = arith.addf %157, %161 : vector<8x32xf32>
    %171 = arith.negf %170 : vector<8x32xf32>
    %172 = math.exp %171 : vector<8x32xf32>
    %cst_82 = arith.constant 1.000000e+00 : f32
    %173 = vector.broadcast %cst_82 : f32 to vector<8x32xf32>
    %174 = arith.addf %173, %172 : vector<8x32xf32>
    %175 = arith.divf %173, %174 : vector<8x32xf32>
    %176 = arith.mulf %169, %163 : vector<8x32xf32>
    %177 = arith.addf %159, %176 : vector<8x32xf32>
    %178 = math.tanh %177 : vector<8x32xf32>
    %179 = arith.mulf %33, %59 : vector<8x32xf32>
    %180 = arith.mulf %38, %61 : vector<8x32xf32>
    %181 = arith.addf %179, %180 : vector<8x32xf32>
    %182 = arith.mulf %43, %63 : vector<8x32xf32>
    %183 = arith.addf %181, %182 : vector<8x32xf32>
    %184 = arith.mulf %48, %105 : vector<8x32xf32>
    %185 = arith.addf %183, %184 : vector<8x32xf32>
    %186 = arith.mulf %53, %149 : vector<8x32xf32>
    %187 = arith.addf %185, %186 : vector<8x32xf32>
    %cst_83 = arith.constant 1.000000e+00 : f32
    %188 = vector.broadcast %cst_83 : f32 to vector<8x32xf32>
    %189 = arith.subf %188, %175 : vector<8x32xf32>
    %190 = arith.mulf %189, %178 : vector<8x32xf32>
    %191 = arith.mulf %175, %149 : vector<8x32xf32>
    %192 = arith.addf %190, %191 : vector<8x32xf32>
    %193 = arith.subf %192, %187 : vector<8x32xf32>
    %194 = arith.index_cast %153 : i32 to index
    %c0_84 = arith.constant 0 : index
    %195 = vector.load %arg21[%194, %c0_84] : memref<64x32xf32, #tpu.memory_space<vmem>>, vector<8x32xf32>
    tpu.vector_store %arg21[%194, %c0_84], %193 {strides = array<i32>} : memref<64x32xf32, #tpu.memory_space<vmem>>, vector<8x32xf32>,
    %c3_i32 = arith.constant 3 : i32
    %c8_i32_85 = arith.constant 8 : i32
    %196 = arith.muli %c3_i32, %c8_i32_85 : i32
    %197 = tpu.assume_multiple %196, 8 : i32
    %198 = arith.index_cast %197 : i32 to index
    %c0_86 = arith.constant 0 : index
    %199 = vector.load %arg18[%198, %c0_86] : memref<64x32xf32, #tpu.memory_space<vmem>>, vector<8x32xf32>
    %200 = arith.index_cast %197 : i32 to index
    %c0_87 = arith.constant 0 : index
    %201 = vector.load %arg19[%200, %c0_87] : memref<64x32xf32, #tpu.memory_space<vmem>>, vector<8x32xf32>
    %202 = arith.index_cast %197 : i32 to index
    %c0_88 = arith.constant 0 : index
    %203 = vector.load %arg20[%202, %c0_88] : memref<64x32xf32, #tpu.memory_space<vmem>>, vector<8x32xf32>
    %cst_89 = arith.constant dense<0.000000e+00> : vector<8x32xf32>
    %204 = tpu.matmul %193, %23, %cst_89 {dimension_numbers = #tpu.dot_dimension_numbers<[1], [0], [0], [1], [0, 0, 1, 1], [], []>} : vector<8x32xf32>, vector<32x32xf32>, vector<8x32xf32> -> vector<8x32xf32>
    %cst_90 = arith.constant dense<0.000000e+00> : vector<8x32xf32>
    %205 = tpu.matmul %193, %24, %cst_90 {dimension_numbers = #tpu.dot_dimension_numbers<[1], [0], [0], [1], [0, 0, 1, 1], [], []>} : vector<8x32xf32>, vector<32x32xf32>, vector<8x32xf32> -> vector<8x32xf32>
    %cst_91 = arith.constant dense<0.000000e+00> : vector<8x32xf32>
    %206 = tpu.matmul %193, %25, %cst_91 {dimension_numbers = #tpu.dot_dimension_numbers<[1], [0], [0], [1], [0, 0, 1, 1], [], []>} : vector<8x32xf32>, vector<32x32xf32>, vector<8x32xf32> -> vector<8x32xf32>
    %207 = arith.addf %206, %28 : vector<8x32xf32>
    %208 = arith.addf %199, %204 : vector<8x32xf32>
    %209 = arith.negf %208 : vector<8x32xf32>
    %210 = math.exp %209 : vector<8x32xf32>
    %cst_92 = arith.constant 1.000000e+00 : f32
    %211 = vector.broadcast %cst_92 : f32 to vector<8x32xf32>
    %212 = arith.addf %211, %210 : vector<8x32xf32>
    %213 = arith.divf %211, %212 : vector<8x32xf32>
    %214 = arith.addf %201, %205 : vector<8x32xf32>
    %215 = arith.negf %214 : vector<8x32xf32>
    %216 = math.exp %215 : vector<8x32xf32>
    %cst_93 = arith.constant 1.000000e+00 : f32
    %217 = vector.broadcast %cst_93 : f32 to vector<8x32xf32>
    %218 = arith.addf %217, %216 : vector<8x32xf32>
    %219 = arith.divf %217, %218 : vector<8x32xf32>
    %220 = arith.mulf %213, %207 : vector<8x32xf32>
    %221 = arith.addf %203, %220 : vector<8x32xf32>
    %222 = math.tanh %221 : vector<8x32xf32>
    %223 = arith.mulf %33, %61 : vector<8x32xf32>
    %224 = arith.mulf %38, %63 : vector<8x32xf32>
    %225 = arith.addf %223, %224 : vector<8x32xf32>
    %226 = arith.mulf %43, %105 : vector<8x32xf32>
    %227 = arith.addf %225, %226 : vector<8x32xf32>
    %228 = arith.mulf %48, %149 : vector<8x32xf32>
    %229 = arith.addf %227, %228 : vector<8x32xf32>
    %230 = arith.mulf %53, %193 : vector<8x32xf32>
    %231 = arith.addf %229, %230 : vector<8x32xf32>
    %cst_94 = arith.constant 1.000000e+00 : f32
    %232 = vector.broadcast %cst_94 : f32 to vector<8x32xf32>
    %233 = arith.subf %232, %219 : vector<8x32xf32>
    %234 = arith.mulf %233, %222 : vector<8x32xf32>
    %235 = arith.mulf %219, %193 : vector<8x32xf32>
    %236 = arith.addf %234, %235 : vector<8x32xf32>
    %237 = arith.subf %236, %231 : vector<8x32xf32>
    %238 = arith.index_cast %197 : i32 to index
    %c0_95 = arith.constant 0 : index
    %239 = vector.load %arg21[%238, %c0_95] : memref<64x32xf32, #tpu.memory_space<vmem>>, vector<8x32xf32>
    tpu.vector_store %arg21[%238, %c0_95], %237 {strides = array<i32>} : memref<64x32xf32, #tpu.memory_space<vmem>>, vector<8x32xf32>,
    %c4_i32 = arith.constant 4 : i32
    %c8_i32_96 = arith.constant 8 : i32
    %240 = arith.muli %c4_i32, %c8_i32_96 : i32
    %241 = tpu.assume_multiple %240, 8 : i32
    %242 = arith.index_cast %241 : i32 to index
    %c0_97 = arith.constant 0 : index
    %243 = vector.load %arg18[%242, %c0_97] : memref<64x32xf32, #tpu.memory_space<vmem>>, vector<8x32xf32>
    %244 = arith.index_cast %241 : i32 to index
    %c0_98 = arith.constant 0 : index
    %245 = vector.load %arg19[%244, %c0_98] : memref<64x32xf32, #tpu.memory_space<vmem>>, vector<8x32xf32>
    %246 = arith.index_cast %241 : i32 to index
    %c0_99 = arith.constant 0 : index
    %247 = vector.load %arg20[%246, %c0_99] : memref<64x32xf32, #tpu.memory_space<vmem>>, vector<8x32xf32>
    %cst_100 = arith.constant dense<0.000000e+00> : vector<8x32xf32>
    %248 = tpu.matmul %237, %23, %cst_100 {dimension_numbers = #tpu.dot_dimension_numbers<[1], [0], [0], [1], [0, 0, 1, 1], [], []>} : vector<8x32xf32>, vector<32x32xf32>, vector<8x32xf32> -> vector<8x32xf32>
    %cst_101 = arith.constant dense<0.000000e+00> : vector<8x32xf32>
    %249 = tpu.matmul %237, %24, %cst_101 {dimension_numbers = #tpu.dot_dimension_numbers<[1], [0], [0], [1], [0, 0, 1, 1], [], []>} : vector<8x32xf32>, vector<32x32xf32>, vector<8x32xf32> -> vector<8x32xf32>
    %cst_102 = arith.constant dense<0.000000e+00> : vector<8x32xf32>
    %250 = tpu.matmul %237, %25, %cst_102 {dimension_numbers = #tpu.dot_dimension_numbers<[1], [0], [0], [1], [0, 0, 1, 1], [], []>} : vector<8x32xf32>, vector<32x32xf32>, vector<8x32xf32> -> vector<8x32xf32>
    %251 = arith.addf %250, %28 : vector<8x32xf32>
    %252 = arith.addf %243, %248 : vector<8x32xf32>
    %253 = arith.negf %252 : vector<8x32xf32>
    %254 = math.exp %253 : vector<8x32xf32>
    %cst_103 = arith.constant 1.000000e+00 : f32
    %255 = vector.broadcast %cst_103 : f32 to vector<8x32xf32>
    %256 = arith.addf %255, %254 : vector<8x32xf32>
    %257 = arith.divf %255, %256 : vector<8x32xf32>
    %258 = arith.addf %245, %249 : vector<8x32xf32>
    %259 = arith.negf %258 : vector<8x32xf32>
    %260 = math.exp %259 : vector<8x32xf32>
    %cst_104 = arith.constant 1.000000e+00 : f32
    %261 = vector.broadcast %cst_104 : f32 to vector<8x32xf32>
    %262 = arith.addf %261, %260 : vector<8x32xf32>
    %263 = arith.divf %261, %262 : vector<8x32xf32>
    %264 = arith.mulf %257, %251 : vector<8x32xf32>
    %265 = arith.addf %247, %264 : vector<8x32xf32>
    %266 = math.tanh %265 : vector<8x32xf32>
    %267 = arith.mulf %33, %63 : vector<8x32xf32>
    %268 = arith.mulf %38, %105 : vector<8x32xf32>
    %269 = arith.addf %267, %268 : vector<8x32xf32>
    %270 = arith.mulf %43, %149 : vector<8x32xf32>
    %271 = arith.addf %269, %270 : vector<8x32xf32>
    %272 = arith.mulf %48, %193 : vector<8x32xf32>
    %273 = arith.addf %271, %272 : vector<8x32xf32>
    %274 = arith.mulf %53, %237 : vector<8x32xf32>
    %275 = arith.addf %273, %274 : vector<8x32xf32>
    %cst_105 = arith.constant 1.000000e+00 : f32
    %276 = vector.broadcast %cst_105 : f32 to vector<8x32xf32>
    %277 = arith.subf %276, %263 : vector<8x32xf32>
    %278 = arith.mulf %277, %266 : vector<8x32xf32>
    %279 = arith.mulf %263, %237 : vector<8x32xf32>
    %280 = arith.addf %278, %279 : vector<8x32xf32>
    %281 = arith.subf %280, %275 : vector<8x32xf32>
    %282 = arith.index_cast %241 : i32 to index
    %c0_106 = arith.constant 0 : index
    %283 = vector.load %arg21[%282, %c0_106] : memref<64x32xf32, #tpu.memory_space<vmem>>, vector<8x32xf32>
    tpu.vector_store %arg21[%282, %c0_106], %281 {strides = array<i32>} : memref<64x32xf32, #tpu.memory_space<vmem>>, vector<8x32xf32>,
    %c5_i32 = arith.constant 5 : i32
    %c8_i32_107 = arith.constant 8 : i32
    %284 = arith.muli %c5_i32, %c8_i32_107 : i32
    %285 = tpu.assume_multiple %284, 8 : i32
    %286 = arith.index_cast %285 : i32 to index
    %c0_108 = arith.constant 0 : index
    %287 = vector.load %arg18[%286, %c0_108] : memref<64x32xf32, #tpu.memory_space<vmem>>, vector<8x32xf32>
    %288 = arith.index_cast %285 : i32 to index
    %c0_109 = arith.constant 0 : index
    %289 = vector.load %arg19[%288, %c0_109] : memref<64x32xf32, #tpu.memory_space<vmem>>, vector<8x32xf32>
    %290 = arith.index_cast %285 : i32 to index
    %c0_110 = arith.constant 0 : index
    %291 = vector.load %arg20[%290, %c0_110] : memref<64x32xf32, #tpu.memory_space<vmem>>, vector<8x32xf32>
    %cst_111 = arith.constant dense<0.000000e+00> : vector<8x32xf32>
    %292 = tpu.matmul %281, %23, %cst_111 {dimension_numbers = #tpu.dot_dimension_numbers<[1], [0], [0], [1], [0, 0, 1, 1], [], []>} : vector<8x32xf32>, vector<32x32xf32>, vector<8x32xf32> -> vector<8x32xf32>
    %cst_112 = arith.constant dense<0.000000e+00> : vector<8x32xf32>
    %293 = tpu.matmul %281, %24, %cst_112 {dimension_numbers = #tpu.dot_dimension_numbers<[1], [0], [0], [1], [0, 0, 1, 1], [], []>} : vector<8x32xf32>, vector<32x32xf32>, vector<8x32xf32> -> vector<8x32xf32>
    %cst_113 = arith.constant dense<0.000000e+00> : vector<8x32xf32>
    %294 = tpu.matmul %281, %25, %cst_113 {dimension_numbers = #tpu.dot_dimension_numbers<[1], [0], [0], [1], [0, 0, 1, 1], [], []>} : vector<8x32xf32>, vector<32x32xf32>, vector<8x32xf32> -> vector<8x32xf32>
    %295 = arith.addf %294, %28 : vector<8x32xf32>
    %296 = arith.addf %287, %292 : vector<8x32xf32>
    %297 = arith.negf %296 : vector<8x32xf32>
    %298 = math.exp %297 : vector<8x32xf32>
    %cst_114 = arith.constant 1.000000e+00 : f32
    %299 = vector.broadcast %cst_114 : f32 to vector<8x32xf32>
    %300 = arith.addf %299, %298 : vector<8x32xf32>
    %301 = arith.divf %299, %300 : vector<8x32xf32>
    %302 = arith.addf %289, %293 : vector<8x32xf32>
    %303 = arith.negf %302 : vector<8x32xf32>
    %304 = math.exp %303 : vector<8x32xf32>
    %cst_115 = arith.constant 1.000000e+00 : f32
    %305 = vector.broadcast %cst_115 : f32 to vector<8x32xf32>
    %306 = arith.addf %305, %304 : vector<8x32xf32>
    %307 = arith.divf %305, %306 : vector<8x32xf32>
    %308 = arith.mulf %301, %295 : vector<8x32xf32>
    %309 = arith.addf %291, %308 : vector<8x32xf32>
    %310 = math.tanh %309 : vector<8x32xf32>
    %311 = arith.mulf %33, %105 : vector<8x32xf32>
    %312 = arith.mulf %38, %149 : vector<8x32xf32>
    %313 = arith.addf %311, %312 : vector<8x32xf32>
    %314 = arith.mulf %43, %193 : vector<8x32xf32>
    %315 = arith.addf %313, %314 : vector<8x32xf32>
    %316 = arith.mulf %48, %237 : vector<8x32xf32>
    %317 = arith.addf %315, %316 : vector<8x32xf32>
    %318 = arith.mulf %53, %281 : vector<8x32xf32>
    %319 = arith.addf %317, %318 : vector<8x32xf32>
    %cst_116 = arith.constant 1.000000e+00 : f32
    %320 = vector.broadcast %cst_116 : f32 to vector<8x32xf32>
    %321 = arith.subf %320, %307 : vector<8x32xf32>
    %322 = arith.mulf %321, %310 : vector<8x32xf32>
    %323 = arith.mulf %307, %281 : vector<8x32xf32>
    %324 = arith.addf %322, %323 : vector<8x32xf32>
    %325 = arith.subf %324, %319 : vector<8x32xf32>
    %326 = arith.index_cast %285 : i32 to index
    %c0_117 = arith.constant 0 : index
    %327 = vector.load %arg21[%326, %c0_117] : memref<64x32xf32, #tpu.memory_space<vmem>>, vector<8x32xf32>
    tpu.vector_store %arg21[%326, %c0_117], %325 {strides = array<i32>} : memref<64x32xf32, #tpu.memory_space<vmem>>, vector<8x32xf32>,
    %c6_i32 = arith.constant 6 : i32
    %c8_i32_118 = arith.constant 8 : i32
    %328 = arith.muli %c6_i32, %c8_i32_118 : i32
    %329 = tpu.assume_multiple %328, 8 : i32
    %330 = arith.index_cast %329 : i32 to index
    %c0_119 = arith.constant 0 : index
    %331 = vector.load %arg18[%330, %c0_119] : memref<64x32xf32, #tpu.memory_space<vmem>>, vector<8x32xf32>
    %332 = arith.index_cast %329 : i32 to index
    %c0_120 = arith.constant 0 : index
    %333 = vector.load %arg19[%332, %c0_120] : memref<64x32xf32, #tpu.memory_space<vmem>>, vector<8x32xf32>
    %334 = arith.index_cast %329 : i32 to index
    %c0_121 = arith.constant 0 : index
    %335 = vector.load %arg20[%334, %c0_121] : memref<64x32xf32, #tpu.memory_space<vmem>>, vector<8x32xf32>
    %cst_122 = arith.constant dense<0.000000e+00> : vector<8x32xf32>
    %336 = tpu.matmul %325, %23, %cst_122 {dimension_numbers = #tpu.dot_dimension_numbers<[1], [0], [0], [1], [0, 0, 1, 1], [], []>} : vector<8x32xf32>, vector<32x32xf32>, vector<8x32xf32> -> vector<8x32xf32>
    %cst_123 = arith.constant dense<0.000000e+00> : vector<8x32xf32>
    %337 = tpu.matmul %325, %24, %cst_123 {dimension_numbers = #tpu.dot_dimension_numbers<[1], [0], [0], [1], [0, 0, 1, 1], [], []>} : vector<8x32xf32>, vector<32x32xf32>, vector<8x32xf32> -> vector<8x32xf32>
    %cst_124 = arith.constant dense<0.000000e+00> : vector<8x32xf32>
    %338 = tpu.matmul %325, %25, %cst_124 {dimension_numbers = #tpu.dot_dimension_numbers<[1], [0], [0], [1], [0, 0, 1, 1], [], []>} : vector<8x32xf32>, vector<32x32xf32>, vector<8x32xf32> -> vector<8x32xf32>
    %339 = arith.addf %338, %28 : vector<8x32xf32>
    %340 = arith.addf %331, %336 : vector<8x32xf32>
    %341 = arith.negf %340 : vector<8x32xf32>
    %342 = math.exp %341 : vector<8x32xf32>
    %cst_125 = arith.constant 1.000000e+00 : f32
    %343 = vector.broadcast %cst_125 : f32 to vector<8x32xf32>
    %344 = arith.addf %343, %342 : vector<8x32xf32>
    %345 = arith.divf %343, %344 : vector<8x32xf32>
    %346 = arith.addf %333, %337 : vector<8x32xf32>
    %347 = arith.negf %346 : vector<8x32xf32>
    %348 = math.exp %347 : vector<8x32xf32>
    %cst_126 = arith.constant 1.000000e+00 : f32
    %349 = vector.broadcast %cst_126 : f32 to vector<8x32xf32>
    %350 = arith.addf %349, %348 : vector<8x32xf32>
    %351 = arith.divf %349, %350 : vector<8x32xf32>
    %352 = arith.mulf %345, %339 : vector<8x32xf32>
    %353 = arith.addf %335, %352 : vector<8x32xf32>
    %354 = math.tanh %353 : vector<8x32xf32>
    %355 = arith.mulf %33, %149 : vector<8x32xf32>
    %356 = arith.mulf %38, %193 : vector<8x32xf32>
    %357 = arith.addf %355, %356 : vector<8x32xf32>
    %358 = arith.mulf %43, %237 : vector<8x32xf32>
    %359 = arith.addf %357, %358 : vector<8x32xf32>
    %360 = arith.mulf %48, %281 : vector<8x32xf32>
    %361 = arith.addf %359, %360 : vector<8x32xf32>
    %362 = arith.mulf %53, %325 : vector<8x32xf32>
    %363 = arith.addf %361, %362 : vector<8x32xf32>
    %cst_127 = arith.constant 1.000000e+00 : f32
    %364 = vector.broadcast %cst_127 : f32 to vector<8x32xf32>
    %365 = arith.subf %364, %351 : vector<8x32xf32>
    %366 = arith.mulf %365, %354 : vector<8x32xf32>
    %367 = arith.mulf %351, %325 : vector<8x32xf32>
    %368 = arith.addf %366, %367 : vector<8x32xf32>
    %369 = arith.subf %368, %363 : vector<8x32xf32>
    %370 = arith.index_cast %329 : i32 to index
    %c0_128 = arith.constant 0 : index
    %371 = vector.load %arg21[%370, %c0_128] : memref<64x32xf32, #tpu.memory_space<vmem>>, vector<8x32xf32>
    tpu.vector_store %arg21[%370, %c0_128], %369 {strides = array<i32>} : memref<64x32xf32, #tpu.memory_space<vmem>>, vector<8x32xf32>,
    %c7_i32 = arith.constant 7 : i32
    %c8_i32_129 = arith.constant 8 : i32
    %372 = arith.muli %c7_i32, %c8_i32_129 : i32
    %373 = tpu.assume_multiple %372, 8 : i32
    %374 = arith.index_cast %373 : i32 to index
    %c0_130 = arith.constant 0 : index
    %375 = vector.load %arg18[%374, %c0_130] : memref<64x32xf32, #tpu.memory_space<vmem>>, vector<8x32xf32>
    %376 = arith.index_cast %373 : i32 to index
    %c0_131 = arith.constant 0 : index
    %377 = vector.load %arg19[%376, %c0_131] : memref<64x32xf32, #tpu.memory_space<vmem>>, vector<8x32xf32>
    %378 = arith.index_cast %373 : i32 to index
    %c0_132 = arith.constant 0 : index
    %379 = vector.load %arg20[%378, %c0_132] : memref<64x32xf32, #tpu.memory_space<vmem>>, vector<8x32xf32>
    %cst_133 = arith.constant dense<0.000000e+00> : vector<8x32xf32>
    %380 = tpu.matmul %369, %23, %cst_133 {dimension_numbers = #tpu.dot_dimension_numbers<[1], [0], [0], [1], [0, 0, 1, 1], [], []>} : vector<8x32xf32>, vector<32x32xf32>, vector<8x32xf32> -> vector<8x32xf32>
    %cst_134 = arith.constant dense<0.000000e+00> : vector<8x32xf32>
    %381 = tpu.matmul %369, %24, %cst_134 {dimension_numbers = #tpu.dot_dimension_numbers<[1], [0], [0], [1], [0, 0, 1, 1], [], []>} : vector<8x32xf32>, vector<32x32xf32>, vector<8x32xf32> -> vector<8x32xf32>
    %cst_135 = arith.constant dense<0.000000e+00> : vector<8x32xf32>
    %382 = tpu.matmul %369, %25, %cst_135 {dimension_numbers = #tpu.dot_dimension_numbers<[1], [0], [0], [1], [0, 0, 1, 1], [], []>} : vector<8x32xf32>, vector<32x32xf32>, vector<8x32xf32> -> vector<8x32xf32>
    %383 = arith.addf %382, %28 : vector<8x32xf32>
    %384 = arith.addf %375, %380 : vector<8x32xf32>
    %385 = arith.negf %384 : vector<8x32xf32>
    %386 = math.exp %385 : vector<8x32xf32>
    %cst_136 = arith.constant 1.000000e+00 : f32
    %387 = vector.broadcast %cst_136 : f32 to vector<8x32xf32>
    %388 = arith.addf %387, %386 : vector<8x32xf32>
    %389 = arith.divf %387, %388 : vector<8x32xf32>
    %390 = arith.addf %377, %381 : vector<8x32xf32>
    %391 = arith.negf %390 : vector<8x32xf32>
    %392 = math.exp %391 : vector<8x32xf32>
    %cst_137 = arith.constant 1.000000e+00 : f32
    %393 = vector.broadcast %cst_137 : f32 to vector<8x32xf32>
    %394 = arith.addf %393, %392 : vector<8x32xf32>
    %395 = arith.divf %393, %394 : vector<8x32xf32>
    %396 = arith.mulf %389, %383 : vector<8x32xf32>
    %397 = arith.addf %379, %396 : vector<8x32xf32>
    %398 = math.tanh %397 : vector<8x32xf32>
    %399 = arith.mulf %33, %193 : vector<8x32xf32>
    %400 = arith.mulf %38, %237 : vector<8x32xf32>
    %401 = arith.addf %399, %400 : vector<8x32xf32>
    %402 = arith.mulf %43, %281 : vector<8x32xf32>
    %403 = arith.addf %401, %402 : vector<8x32xf32>
    %404 = arith.mulf %48, %325 : vector<8x32xf32>
    %405 = arith.addf %403, %404 : vector<8x32xf32>
    %406 = arith.mulf %53, %369 : vector<8x32xf32>
    %407 = arith.addf %405, %406 : vector<8x32xf32>
    %cst_138 = arith.constant 1.000000e+00 : f32
    %408 = vector.broadcast %cst_138 : f32 to vector<8x32xf32>
    %409 = arith.subf %408, %395 : vector<8x32xf32>
    %410 = arith.mulf %409, %398 : vector<8x32xf32>
    %411 = arith.mulf %395, %369 : vector<8x32xf32>
    %412 = arith.addf %410, %411 : vector<8x32xf32>
    %413 = arith.subf %412, %407 : vector<8x32xf32>
    %414 = arith.index_cast %373 : i32 to index
    %c0_139 = arith.constant 0 : index
    %415 = vector.load %arg21[%414, %c0_139] : memref<64x32xf32, #tpu.memory_space<vmem>>, vector<8x32xf32>
    tpu.vector_store %arg21[%414, %c0_139], %413 {strides = array<i32>} : memref<64x32xf32, #tpu.memory_space<vmem>>, vector<8x32xf32>,
    %c8_i32_140 = arith.constant 8 : i32
    %c0_141 = arith.constant 0 : index
    %c0_142 = arith.constant 0 : index
    %c0_143 = arith.constant 0 : index
    %416 = vector.load %arg22[%c0_141, %c0_142, %c0_143] : memref<5x8x32xf32, #tpu.memory_space<vmem>>, vector<1x8x32xf32>
    %417 = vector.shape_cast %416 : vector<1x8x32xf32> to vector<8x32xf32>
    %418 = vector.shape_cast %237 : vector<8x32xf32> to vector<1x8x32xf32>
    tpu.vector_store %arg22[%c0_141, %c0_142, %c0_143], %418 {strides = array<i32>} : memref<5x8x32xf32, #tpu.memory_space<vmem>>, vector<1x8x32xf32>,
    %c1_144 = arith.constant 1 : index
    %c0_145 = arith.constant 0 : index
    %c0_146 = arith.constant 0 : index
    %419 = vector.load %arg22[%c1_144, %c0_145, %c0_146] : memref<5x8x32xf32, #tpu.memory_space<vmem>>, vector<1x8x32xf32>
    %420 = vector.shape_cast %419 : vector<1x8x32xf32> to vector<8x32xf32>
    %421 = vector.shape_cast %281 : vector<8x32xf32> to vector<1x8x32xf32>
    tpu.vector_store %arg22[%c1_144, %c0_145, %c0_146], %421 {strides = array<i32>} : memref<5x8x32xf32, #tpu.memory_space<vmem>>, vector<1x8x32xf32>,
    %c2_147 = arith.constant 2 : index
    %c0_148 = arith.constant 0 : index
    %c0_149 = arith.constant 0 : index
    %422 = vector.load %arg22[%c2_147, %c0_148, %c0_149] : memref<5x8x32xf32, #tpu.memory_space<vmem>>, vector<1x8x32xf32>
    %423 = vector.shape_cast %422 : vector<1x8x32xf32> to vector<8x32xf32>
    %424 = vector.shape_cast %325 : vector<8x32xf32> to vector<1x8x32xf32>
    tpu.vector_store %arg22[%c2_147, %c0_148, %c0_149], %424 {strides = array<i32>} : memref<5x8x32xf32, #tpu.memory_space<vmem>>, vector<1x8x32xf32>,
    %c3_150 = arith.constant 3 : index
    %c0_151 = arith.constant 0 : index
    %c0_152 = arith.constant 0 : index
    %425 = vector.load %arg22[%c3_150, %c0_151, %c0_152] : memref<5x8x32xf32, #tpu.memory_space<vmem>>, vector<1x8x32xf32>
    %426 = vector.shape_cast %425 : vector<1x8x32xf32> to vector<8x32xf32>
    %427 = vector.shape_cast %369 : vector<8x32xf32> to vector<1x8x32xf32>
    tpu.vector_store %arg22[%c3_150, %c0_151, %c0_152], %427 {strides = array<i32>} : memref<5x8x32xf32, #tpu.memory_space<vmem>>, vector<1x8x32xf32>,
    %c4_153 = arith.constant 4 : index
    %c0_154 = arith.constant 0 : index
    %c0_155 = arith.constant 0 : index
    %428 = vector.load %arg22[%c4_153, %c0_154, %c0_155] : memref<5x8x32xf32, #tpu.memory_space<vmem>>, vector<1x8x32xf32>
    %429 = vector.shape_cast %428 : vector<1x8x32xf32> to vector<8x32xf32>
    %430 = vector.shape_cast %413 : vector<8x32xf32> to vector<1x8x32xf32>
    tpu.vector_store %arg22[%c4_153, %c0_154, %c0_155], %430 {strides = array<i32>} : memref<5x8x32xf32, #tpu.memory_space<vmem>>, vector<1x8x32xf32>,
    %c0_156 = arith.constant 0 : index
    %c0_157 = arith.constant 0 : index
    %431 = vector.load %arg21[%c0_156, %c0_157] : memref<64x32xf32, #tpu.memory_space<vmem>>, vector<64x32xf32>
    %c0_158 = arith.constant 0 : index
    %c0_159 = arith.constant 0 : index
    %432 = vector.load %arg14[%c0_158, %c0_159] : memref<32x128xf32, #tpu.memory_space<vmem>>, vector<32x128xf32>
    %cst_160 = arith.constant dense<0.000000e+00> : vector<64x128xf32>
    %433 = tpu.matmul %431, %432, %cst_160 {dimension_numbers = #tpu.dot_dimension_numbers<[1], [0], [0], [1], [0, 0, 1, 1], [], []>} : vector<64x32xf32>, vector<32x128xf32>, vector<64x128xf32> -> vector<64x128xf32>
    %c0_161 = arith.constant 0 : index
    %c0_162 = arith.constant 0 : index
    %434 = vector.load %arg15[%c0_161, %c0_162] : memref<1x128xf32, #tpu.memory_space<vmem>>, vector<1x128xf32>
    %435 = vector.broadcast %434 : vector<1x128xf32> to vector<64x128xf32>
    %436 = arith.addf %433, %435 : vector<64x128xf32>
    %437 = math.tanh %436 : vector<64x128xf32>
    %438 = vector.shape_cast %437 : vector<64x128xf32> to vector<8x8x128xf32>
    %c0_163 = arith.constant 0 : index
    %c0_164 = arith.constant 0 : index
    %c0_165 = arith.constant 0 : index
    %439 = vector.load %arg16[%c0_163, %c0_164, %c0_165] : memref<8x8x128xf32, #tpu.memory_space<vmem>>, vector<8x8x128xf32>
    tpu.vector_store %arg16[%c0_163, %c0_164, %c0_165], %438 {strides = array<i32>} : memref<8x8x128xf32, #tpu.memory_space<vmem>>, vector<8x8x128xf32>,
    %c0_i32_166 = arith.constant 0 : i32
    %440 = arith.cmpi eq, %arg1, %c0_i32_166 : i32
    %441 = arith.extui %440 : i1 to i32
    %c0_i32_167 = arith.constant 0 : i32
    %442 = arith.cmpi ne, %441, %c0_i32_167 : i32
    scf.if %442 {
      %c0_168 = arith.constant 0 : index
      %c0_169 = arith.constant 0 : index
      %c0_170 = arith.constant 0 : index
      %443 = vector.load %arg22[%c0_168, %c0_169, %c0_170] : memref<5x8x32xf32, #tpu.memory_space<vmem>>, vector<5x8x32xf32>
      %c0_171 = arith.constant 0 : index
      %c0_172 = arith.constant 0 : index
      %c0_173 = arith.constant 0 : index
      %444 = vector.load %arg17[%c0_171, %c0_172, %c0_173] : memref<5x8x32xf32, #tpu.memory_space<vmem>>, vector<5x8x32xf32>
      tpu.vector_store %arg17[%c0_171, %c0_172, %c0_173], %443 {strides = array<i32>} : memref<5x8x32xf32, #tpu.memory_space<vmem>>, vector<5x8x32xf32>,
    } else {
    }
    return
  }
  func.func @transform_0(%arg0: i32, %arg1: i32) -> (i32, i32, i32) {
    %c0_i32 = arith.constant 0 : i32
    %c0_i32_0 = arith.constant 0 : i32
    return %arg1, %arg0, %c0_i32 : i32, i32, i32
  }
  func.func @transform_1(%arg0: i32, %arg1: i32) -> (i32, i32) {
    %c0_i32 = arith.constant 0 : i32
    %c0_i32_0 = arith.constant 0 : i32
    %c0_i32_1 = arith.constant 0 : i32
    return %c0_i32, %c0_i32_0 : i32, i32
  }
  func.func @transform_2(%arg0: i32, %arg1: i32) -> (i32, i32) {
    %c0_i32 = arith.constant 0 : i32
    %c0_i32_0 = arith.constant 0 : i32
    %c0_i32_1 = arith.constant 0 : i32
    return %c0_i32, %c0_i32_0 : i32, i32
  }
  func.func @transform_3(%arg0: i32, %arg1: i32) -> (i32, i32) {
    %c0_i32 = arith.constant 0 : i32
    %c0_i32_0 = arith.constant 0 : i32
    %c0_i32_1 = arith.constant 0 : i32
    return %c0_i32, %c0_i32_0 : i32, i32
  }
  func.func @transform_4(%arg0: i32, %arg1: i32) -> (i32, i32) {
    %c0_i32 = arith.constant 0 : i32
    %c0_i32_0 = arith.constant 0 : i32
    %c0_i32_1 = arith.constant 0 : i32
    return %c0_i32, %c0_i32_0 : i32, i32
  }
  func.func @transform_5(%arg0: i32, %arg1: i32) -> (i32, i32) {
    %c0_i32 = arith.constant 0 : i32
    %c0_i32_0 = arith.constant 0 : i32
    %c0_i32_1 = arith.constant 0 : i32
    return %c0_i32, %c0_i32_0 : i32, i32
  }
  func.func @transform_6(%arg0: i32, %arg1: i32) -> (i32, i32) {
    %c0_i32 = arith.constant 0 : i32
    %c0_i32_0 = arith.constant 0 : i32
    %c0_i32_1 = arith.constant 0 : i32
    return %c0_i32, %c0_i32_0 : i32, i32
  }
  func.func @transform_7(%arg0: i32, %arg1: i32) -> (i32, i32) {
    %c0_i32 = arith.constant 0 : i32
    %c0_i32_0 = arith.constant 0 : i32
    %c0_i32_1 = arith.constant 0 : i32
    return %c0_i32, %c0_i32_0 : i32, i32
  }
  func.func @transform_8(%arg0: i32, %arg1: i32) -> (i32, i32) {
    %c0_i32 = arith.constant 0 : i32
    %c0_i32_0 = arith.constant 0 : i32
    %c0_i32_1 = arith.constant 0 : i32
    return %c0_i32, %c0_i32_0 : i32, i32
  }
  func.func @transform_9(%arg0: i32, %arg1: i32) -> (i32, i32) {
    %c0_i32 = arith.constant 0 : i32
    %c0_i32_0 = arith.constant 0 : i32
    %c0_i32_1 = arith.constant 0 : i32
    return %c0_i32, %c0_i32_0 : i32, i32
  }
  func.func @transform_10(%arg0: i32, %arg1: i32) -> (i32, i32) {
    %c0_i32 = arith.constant 0 : i32
    %c0_i32_0 = arith.constant 0 : i32
    %c0_i32_1 = arith.constant 0 : i32
    return %c0_i32, %c0_i32_0 : i32, i32
  }
  func.func @transform_11(%arg0: i32, %arg1: i32) -> (i32, i32) {
    %c0_i32 = arith.constant 0 : i32
    %c0_i32_0 = arith.constant 0 : i32
    %c0_i32_1 = arith.constant 0 : i32
    return %c0_i32, %c0_i32_0 : i32, i32
  }
  func.func @transform_12(%arg0: i32, %arg1: i32) -> (i32, i32) {
    %c0_i32 = arith.constant 0 : i32
    %c0_i32_0 = arith.constant 0 : i32
    %c0_i32_1 = arith.constant 0 : i32
    return %c0_i32, %c0_i32_0 : i32, i32
  }
  func.func @transform_13(%arg0: i32, %arg1: i32) -> (i32, i32) {
    %c0_i32 = arith.constant 0 : i32
    %c0_i32_0 = arith.constant 0 : i32
    %c0_i32_1 = arith.constant 0 : i32
    return %c0_i32, %c0_i32_0 : i32, i32
  }
  func.func @transform_14(%arg0: i32, %arg1: i32) -> (i32, i32, i32) {
    %c0_i32 = arith.constant 0 : i32
    %c0_i32_0 = arith.constant 0 : i32
    return %arg1, %arg0, %c0_i32 : i32, i32, i32
  }
  func.func @transform_15(%arg0: i32, %arg1: i32) -> (i32, i32, i32) {
    %c0_i32 = arith.constant 0 : i32
    %c0_i32_0 = arith.constant 0 : i32
    %c0_i32_1 = arith.constant 0 : i32
    return %c0_i32, %arg0, %c0_i32_0 : i32, i32, i32
  }
}

</mosaic_0001>

<bundles_post_ra>
// kernel: mrnnf_forward.1
= control target key start
LH: loop header
LB: loop body
LE: loop exit
PB: predicated region body
PF: predicated region fallthrough
CT: control target
= control target key end

     0   :  { %vm100_vm0 = vcmask 1043456   ;;  %vm75_vm1 = vcmask 31744   ;;  %vm53_vm2 = vcmask 261120   ;;  %v3409_v5 = vmov 0.0   ;;  %s4243_s1 = inlined_call_operand.vmem [shape: f32[4,32], index: 1, kind: input, shape index: {}]   ;;  %s4244_s0 = inlined_call_operand.vmem [shape: f32[8,8,4], index: 0, kind: input, shape index: {}]   ;;  %s4245_s2 = inlined_call_operand.vmem [shape: f32[4,32], index: 2, kind: input, shape index: {}]   ;;  %s4246_s3 = inlined_call_operand.vmem [shape: f32[4,32], index: 3, kind: input, shape index: {}]   ;;  %s4247_s6 = inlined_call_operand.vmem [shape: f32[32,32], index: 6, kind: input, shape index: {}]   ;;  %s4248_s4 = inlined_call_operand.vmem [shape: f32[32,32], index: 4, kind: input, shape index: {}]   ;;  %s4249_s5 = inlined_call_operand.vmem [shape: f32[32,32], index: 5, kind: input, shape index: {}]   ;;  %s4250_s7 = inlined_call_operand.vmem [shape: f32[1,32], index: 7, kind: input, shape index: {}]   ;;  %s4251_s9 = inlined_call_operand.vmem [shape: f32[1,32], index: 9, kind: input, shape index: {}]   ;;  %s4252_s8 = inlined_call_operand.vmem [shape: f32[1,32], index: 8, kind: input, shape index: {}]   ;;  %s4253_s10 = inlined_call_operand.vmem [shape: f32[1,32], index: 10, kind: input, shape index: {}]   ;;  %s4254_s11 = inlined_call_operand.vmem [shape: f32[5,32], index: 11, kind: input, shape index: {}]   ;;  %s4255_s15 = inlined_call_operand.vmem [shape: f32[5,8,32], index: 15, kind: output, shape index: {1}]   ;;  %s4256_s12 = inlined_call_operand.vmem [shape: f32[32,128], index: 12, kind: input, shape index: {}]   ;;  %s4257_s13 = inlined_call_operand.vmem [shape: f32[1,128], index: 13, kind: input, shape index: {}]   ;;  %s4258_s14 = inlined_call_operand.vmem [shape: f32[8,8,128], index: 14, kind: output, shape index: {0}]  }
   0x1   :  { %v67_v0 = vld [vmem:[%s4243_s1] sm:$0xf]  ;;  %v61_v1 = vld [vmem:[%s4244_s0 + $0x10] sm:$0xff]  ;;  %v62_v2 = vld [vmem:[%s4244_s0 + $0x18] sm:$0xff]  ;;  %58 = vst.msk [vmem:[#allocation6 + $0x20] sm:$0xff] %vm53_vm2, %v3409_v5  ;;  %vm3410_vm3 = vmmov 0  }
   0x2   :  { %3291 = vmatprep.subr.msk.mxu1 %vm100_vm0, %v67_v0  ;;  %2970 = vmatprep.mubr.msk.f32.mxu1 %vm75_vm1, %v61_v1  ;;  %v218_v3 = vld [vmem:[%s4245_s2] sm:$0xf]  ;;  %54 = vst.msk [vmem:[#allocation6] sm:$0xff] %vm53_vm2, %v3409_v5  ;;  %55 = vst.msk [vmem:[#allocation6 + $0x8] sm:$0xff] %vm53_vm2, %v3409_v5  ;;  %v64_v6 = vld [vmem:[%s4244_s0 + $0x28] sm:$0xff] }
   0x3   :  { %v63_v4 = vld [vmem:[%s4244_s0 + $0x20] sm:$0xff]  ;;  %56 = vst.msk [vmem:[#allocation6 + $0x10] sm:$0xff] %vm53_vm2, %v3409_v5  ;;  %57 = vst.msk [vmem:[#allocation6 + $0x18] sm:$0xff] %vm53_vm2, %v3409_v5  ;;  %3292 = vmatpush3.msk.msra.mxu1 %vm100_vm0, %v67_v0  ;;  %2965 = vmatprep.subr.msk.mxu0 %vm100_vm0, %v67_v0  ;;  %v65_v7 = vld [vmem:[%s4244_s0 + $0x30] sm:$0xff] }
   0x4   :  { %2971 = vmatmul.mubr.msk.f32.vlgmr.msra.gmra.mxu1 %vm75_vm1, %v62_v2  ;;  %2979 = vmatprep.subr.msk.mxu1 %vm100_vm0, %v218_v3  ;;  %v59_v8 = vld [vmem:[%s4244_s0] sm:$0xff]  ;;  %v60_v9 = vld [vmem:[%s4244_s0 + $0x8] sm:$0xff]  ;;  %v66_v11 = vld [vmem:[%s4244_s0 + $0x38] sm:$0xff] }
   0x5   :  { %2980 = vmatpush3.msk.msra.mxu1 %vm100_vm0, %v218_v3  ;;  %2973 = vmatprep.mubr.msk.f32.mxu1 %vm75_vm1, %v63_v4  ;;  %v342_v10 = vld [vmem:[%s4246_s3] sm:$0xf]  ;;  %v3554_v12 = vld [vmem:[%s4247_s6 + $0x18] sm:$0xff]  ;;  %v3562_v13 = vld [vmem:[%s4247_s6 + $0x10] sm:$0xff] }
   0x6   :  { %3007 = vmatprep.subr.mxu1 %v3409_v5  ;;  %2966 = vmatpush3.msk.msra.mxu0 %vm100_vm0, %v67_v0  ;;  %v3569_v14 = vld [vmem:[%s4248_s4 + $0x18] sm:$0xff]  ;;  %v3578_v15 = vld [vmem:[%s4248_s4 + $0x10] sm:$0xff]  ;;  %v3587_v16 = vld [vmem:[%s4248_s4 + $0x8] sm:$0xff] }
   0x7   :  { %2967 = vmatprep.mubr.msk.f32.mxu0 %vm75_vm1, %v59_v8  ;;  %2993 = vmatprep.subr.msk.mxu0 %vm100_vm0, %v342_v10  ;;  %v3597_v17 = vld [vmem:[%s4248_s4] sm:$0xff]  ;;  %v3602_v18 = vld [vmem:[%s4247_s6 + $0x8] sm:$0xff]  ;;  %v3633_v21 = vld [vmem:[%s4249_s5 + $0x18] sm:$0xff] }
   0x8   :  { %2974 = vmatmul.mubr.msk.f32.gmra.mxu1 %vm75_vm1, %v64_v6  ;;  %2968 = vmatmul.mubr.msk.f32.vlgmr.msra.gmra.mxu0 %vm75_vm1, %v60_v9  ;;  %v3615_v19 = vld [vmem:[%s4247_s6] sm:$0xff]  ;;  %v3645_v22 = vld [vmem:[%s4249_s5 + $0x10] sm:$0xff]  ;;  %v3655_v23 = vld [vmem:[%s4249_s5 + $0x8] sm:$0xff] }
   0x9   :  { %2976 = vmatprep.mubr.msk.f32.mxu1 %vm75_vm1, %v65_v7  ;;  %2994 = vmatpush3.msk.msra.mxu0 %vm100_vm0, %v342_v10  ;;  %v3628_v20 = vld [vmem:[#allocation6 + $0x20] sm:$0xff] }
   0xa   :  { %2995 = vmatprep.mubr.msk.f32.mxu0 %vm75_vm1, %v59_v8  ;;  %3029 = vmatprep.subr.mxu0 %v3409_v5  ;;  %v3664_v24 = vld [vmem:[%s4249_s5] sm:$0xff] }
   0xb   :  { %v2721_v25 = vld [vmem:[%s4250_s7] ss:$0 sm:$0xff] }
   0xc   :  { %2977 = vmatmul.mubr.msk.f32.gmra.mxu1 %vm75_vm1, %v66_v11  ;;  %2996 = vmatmul.mubr.msk.f32.vlgmr.msra.gmra.mxu0 %vm75_vm1, %v60_v9  ;;  %v2741_v36 = vld [vmem:[%s4251_s9] ss:$0 sm:$0xff] }
   0xd   :  { %2981 = vmatprep.mubr.msk.f32.mxu1 %vm75_vm1, %v59_v8  ;;  %3030 = vmatpush3.msra.mxu0 %v3554_v12  ;;  %v2731_v44 = vld [vmem:[%s4252_s8] ss:$0 sm:$0xff] }
   0xe   :  { %2998 = vmatprep.mubr.msk.f32.mxu0 %vm75_vm1, %v61_v1  ;;  %3031 = vmatprep.subr.mxu0 %v3409_v5 }
   0xf   :  { %3032 = vmatpush3.msra.mxu0 %v3562_v13 }
  0x10   :  { %2982 = vmatmul.mubr.msk.f32.vlgmr.msra.gmra.mxu1 %vm75_vm1, %v60_v9  ;;  %2999 = vmatmul.mubr.msk.f32.gmra.mxu0 %vm75_vm1, %v62_v2 }
  0x11   :  { %3008 = vmatpush3.msra.mxu1 %v3569_v14  ;;  %2984 = vmatprep.mubr.msk.f32.mxu1 %vm75_vm1, %v61_v1 }
  0x12   :  { %3009 = vmatprep.subr.mxu1 %v3409_v5  ;;  %3001 = vmatprep.mubr.msk.f32.mxu0 %vm75_vm1, %v63_v4 }
  0x13   :  { %3010 = vmatpush3.msra.mxu1 %v3578_v15  ;;  %3033 = vmatprep.subr.mxu0 %v3409_v5 }
  0x14   :  { %2985 = vmatmul.mubr.msk.f32.gmra.mxu1 %vm75_vm1, %v62_v2  ;;  %3011 = vmatprep.subr.mxu1 %v3409_v5 }
  0x15   :  { %2987 = vmatprep.mubr.msk.f32.mxu1 %vm75_vm1, %v63_v4  ;;  %3012 = vmatpush3.msra.mxu1 %v3587_v16 }
  0x16   :  { %3013 = vmatprep.subr.mxu1 %v3409_v5  ;;  %3002 = vmatmul.mubr.msk.f32.gmra.mxu0 %vm75_vm1, %v64_v6 }
  0x17   :  { %3014 = vmatpush3.msra.mxu1 %v3597_v17  ;;  %3034 = vmatpush3.msra.mxu0 %v3602_v18 }
  0x18   :  { %2988 = vmatmul.mubr.msk.f32.gmra.mxu1 %vm75_vm1, %v64_v6  ;;  %3018 = vmatprep.subr.mxu1 %v3409_v5 }
  0x19   :  { %2990 = vmatprep.mubr.msk.f32.mxu1 %vm75_vm1, %v65_v7  ;;  %3004 = vmatprep.mubr.msk.f32.mxu0 %vm75_vm1, %v65_v7 }
  0x1a   :  { %3005 = vmatmul.mubr.msk.f32.gmra.mxu0 %vm75_vm1, %v66_v11  ;;  %3035 = vmatprep.subr.mxu0 %v3409_v5 }
  0x1b   :  { %3036 = vmatpush3.msra.mxu0 %v3615_v19  ;;  %3037 = vmatprep.mubr.msk.f32.mxu0 %vm3410_vm3, %v3409_v5 }
  0x1c   :  { %2991 = vmatmul.mubr.msk.f32.gmra.mxu1 %vm75_vm1, %v66_v11  ;;  %3051 = vmatprep.subr.mxu0 %v3409_v5 }
  0x1d   :  { %3015 = vmatprep.mubr.msk.f32.mxu1 %vm3410_vm3, %v3409_v5 }
  0x1e   :  { %3038 = vmatmul.mubr.msk.f32.vlgmr.msra.gmra.mxu0 %vm53_vm2, %v3628_v20 }
  0x1f   :  { %3052 = vmatpush3.msra.mxu0 %v3633_v21  ;;  %3059 = vmatprep.mubr.msk.f32.mxu0 %vm3410_vm3, %v3409_v5 }
  0x20   :  { %3016 = vmatmul.mubr.msk.f32.vlgmr.msra.gmra.mxu1 %vm53_vm2, %v3628_v20  ;;  %3053 = vmatprep.subr.mxu0 %v3409_v5 }
  0x21   :  { %3019 = vmatpush3.msra.mxu1 %v3633_v21  ;;  %3026 = vmatprep.mubr.msk.f32.mxu1 %vm3410_vm3, %v3409_v5 }
  0x22   :  { %3020 = vmatprep.subr.mxu1 %v3409_v5  ;;  %3054 = vmatpush3.msra.mxu0 %v3645_v22 }
  0x23   :  { %3021 = vmatpush3.msra.mxu1 %v3645_v22  ;;  %3055 = vmatprep.subr.mxu0 %v3409_v5 }
  0x24   :  { %3022 = vmatprep.subr.mxu1 %v3409_v5  ;;  %3056 = vmatpush3.msra.mxu0 %v3655_v23 }
  0x25   :  { %3023 = vmatpush3.msra.mxu1 %v3655_v23  ;;  %3057 = vmatprep.subr.mxu0 %v3409_v5 }
  0x26   :  { %3024 = vmatprep.subr.mxu1 %v3409_v5  ;;  %3058 = vmatpush3.msra.mxu0 %v3664_v24 }
  0x27   :  { %3025 = vmatpush3.msra.mxu1 %v3664_v24  ;;  %3073 = vmatprep.subr.mxu0 %v3409_v5 }
  0x28   :  { %3027 = vmatmul.mubr.msk.f32.vlgmr.msra.gmra.mxu1 %vm53_vm2, %v3628_v20  ;;  %3040 = vmatprep.subr.mxu1 %v3409_v5 }
  0x29   :  { %3041 = vmatpush3.msra.mxu1 %v3569_v14  ;;  %3048 = vmatprep.mubr.msk.f32.mxu1 %vm3410_vm3, %v3409_v5 }
  0x2a   :  { %3042 = vmatprep.subr.mxu1 %v3409_v5 }
  0x2b   :  { %3043 = vmatpush3.msra.mxu1 %v3578_v15 }
  0x2c   :  { %3044 = vmatprep.subr.mxu1 %v3409_v5 }
  0x2d   :  { %3045 = vmatpush3.msra.mxu1 %v3587_v16 }
  0x2e   :  { %3046 = vmatprep.subr.mxu1 %v3409_v5 }
  0x2f   :  { %3047 = vmatpush3.msra.mxu1 %v3597_v17 }
  0x30   :  { %3062 = vmatprep.subr.mxu1 %v3409_v5 }
  0xc4   :  { %v2972_v26 = vpop.f32.mrf.mxu1 }
  0xc5   :  { %v186_v27 = vadd.f32 %v2972_v26, %v2721_v25 }
  0xc6   :  { %v180_v28 = vpop.f32.mrf.mxu1 }
  0xc7   :  { %213 = vst.msk [vmem:[#allocation2 + $0x18] sm:$0xff] %vm53_vm2, %v186_v27  ;;  %v181_v29 = vadd.f32 %v2721_v25, %v180_v28 }
  0xc8   :  { %v2975_v30 = vpop.f32.mrf.mxu1  ;;  %v2969_v31 = vpop.f32.mrf.mxu0 }
  0xc9   :  { %212 = vst.msk [vmem:[#allocation2 + $0x10] sm:$0xff] %vm53_vm2, %v181_v29  ;;  %v196_v32 = vadd.f32 %v2975_v30, %v2721_v25  ;;  %v176_v33 = vadd.f32 %v2969_v31, %v2721_v25 }
  0xca   :  { %v190_v34 = vpop.f32.mrf.mxu1  ;;  %v170_v35 = vpop.f32.mrf.mxu0 }
  0xcb   :  { %215 = vst.msk [vmem:[#allocation2 + $0x28] sm:$0xff] %vm53_vm2, %v196_v32  ;;  %v191_v37 = vadd.f32 %v2721_v25, %v190_v34  ;;  %211 = vst.msk [vmem:[#allocation2 + $0x8] sm:$0xff] %vm53_vm2, %v176_v33  ;;  %v171_v38 = vadd.f32 %v2721_v25, %v170_v35 }
  0xcc   :  { %v2978_v39 = vpop.f32.mrf.mxu1  ;;  %v2997_v40 = vpop.f32.mrf.mxu0 }
  0xcd   :  { %214 = vst.msk [vmem:[#allocation2 + $0x20] sm:$0xff] %vm53_vm2, %v191_v37  ;;  %v206_v41 = vadd.f32 %v2978_v39, %v2721_v25  ;;  %210 = vst.msk [vmem:[#allocation2] sm:$0xff] %vm53_vm2, %v171_v38  ;;  %v425_v42 = vadd.f32 %v2997_v40, %v2741_v36 }
  0xce   :  { %v200_v43 = vpop.f32.mrf.mxu1  ;;  %v419_v45 = vpop.f32.mrf.mxu0 }
  0xcf   :  { %217 = vst.msk [vmem:[#allocation2 + $0x38] sm:$0xff] %vm53_vm2, %v206_v41  ;;  %v201_v46 = vadd.f32 %v2721_v25, %v200_v43  ;;  %459 = vst.msk [vmem:[#allocation4 + $0x8] sm:$0xff] %vm53_vm2, %v425_v42  ;;  %v420_v47 = vadd.f32 %v2741_v36, %v419_v45  ;;  %v3722_v41 = vld [vmem:[%s4253_s10] ss:$0 sm:$0xff] }
  0xd0   :  { %v2983_v48 = vpop.f32.mrf.mxu1  ;;  %v3000_v49 = vpop.f32.mrf.mxu0 }
  0xd1   :  { %216 = vst.msk [vmem:[#allocation2 + $0x30] sm:$0xff] %vm53_vm2, %v201_v46  ;;  %v301_v50 = vadd.f32 %v2983_v48, %v2731_v44  ;;  %458 = vst.msk [vmem:[#allocation4] sm:$0xff] %vm53_vm2, %v420_v47  ;;  %v435_v51 = vadd.f32 %v3000_v49, %v2741_v36  ;;  %v3728_v46 = vld [vmem:[%s4254_s11] ss:$0 sm:$0xff]  ;;  %v3733_v47 = vld [vmem:[%s4254_s11 + $0x1] ss:$0 sm:$0xff] }
  0xd2   :  { %v295_v52 = vpop.f32.mrf.mxu1  ;;  %v429_v53 = vpop.f32.mrf.mxu0  ;;  %v3735_v48 = vld [vmem:[#allocation6 + $0x8] sm:$0xff] }
  0xd3   :  { %335 = vst.msk [vmem:[#allocation3 + $0x8] sm:$0xff] %vm53_vm2, %v301_v50  ;;  %v296_v54 = vadd.f32 %v2731_v44, %v295_v52  ;;  %461 = vst.msk [vmem:[#allocation4 + $0x18] sm:$0xff] %vm53_vm2, %v435_v51  ;;  %v430_v55 = vadd.f32 %v2741_v36, %v429_v53  ;;  %v753_v53 = vmul.f32 %v3733_v47, %v3735_v48 }
  0xd4   :  { %v2986_v56 = vpop.f32.mrf.mxu1  ;;  %v519_v27 = vld [vmem:[#allocation2] sm:$0xff] }
  0xd5   :  { %334 = vst.msk [vmem:[#allocation3] sm:$0xff] %vm53_vm2, %v296_v54  ;;  %v311_v57 = vadd.f32 %v2986_v56, %v2731_v44  ;;  %460 = vst.msk [vmem:[#allocation4 + $0x10] sm:$0xff] %vm53_vm2, %v430_v55  ;;  %v3743_v54 = vld [vmem:[%s4254_s11 + $0x2] ss:$0 sm:$0xff]  ;;  %v3745_v55 = vld [vmem:[#allocation6 + $0x10] sm:$0xff] }
  0xd6   :  { %v305_v58 = vpop.f32.mrf.mxu1  ;;  %v3003_v59 = vpop.f32.mrf.mxu0 }
  0xd7   :  { %337 = vst.msk [vmem:[#allocation3 + $0x18] sm:$0xff] %vm53_vm2, %v311_v57  ;;  %v306_v60 = vadd.f32 %v2731_v44, %v305_v58  ;;  %v445_v61 = vadd.f32 %v3003_v59, %v2741_v36  ;;  %v755_v57 = vmul.f32 %v3743_v54, %v3745_v55  ;;  %v3752_v58 = vld [vmem:[%s4254_s11 + $0x3] ss:$0 sm:$0xff]  ;;  %v3754_v59 = vld [vmem:[#allocation6 + $0x18] sm:$0xff] }
  0xd8   :  { %v2989_v62 = vpop.f32.mrf.mxu1  ;;  %v439_v63 = vpop.f32.mrf.mxu0  ;;  %v521_v50 = vld [vmem:[#allocation4] sm:$0xff] }
  0xd9   :  { %336 = vst.msk [vmem:[#allocation3 + $0x10] sm:$0xff] %vm53_vm2, %v306_v60  ;;  %v321_v0 = vadd.f32 %v2989_v62, %v2731_v44  ;;  %463 = vst.msk [vmem:[#allocation4 + $0x28] sm:$0xff] %vm53_vm2, %v445_v61  ;;  %v440_v1 = vadd.f32 %v2741_v36, %v439_v63  ;;  %v757_v61 = vmul.f32 %v3752_v58, %v3754_v59  ;;  %v3761_v62 = vld [vmem:[%s4254_s11 + $0x4] ss:$0 sm:$0xff] }
  0xda   :  { %v315_v2 = vpop.f32.mrf.mxu1  ;;  %v3006_v3 = vpop.f32.mrf.mxu0 }
  0xdb   :  { %339 = vst.msk [vmem:[#allocation3 + $0x28] sm:$0xff] %vm53_vm2, %v321_v0  ;;  %v316_v4 = vadd.f32 %v2731_v44, %v315_v2  ;;  %462 = vst.msk [vmem:[#allocation4 + $0x20] sm:$0xff] %vm53_vm2, %v440_v1  ;;  %v455_v6 = vadd.f32 %v3006_v3, %v2741_v36  ;;  %v759_v1 = vmul.f32 %v3761_v62, %v3628_v20 }
  0xdc   :  { %v2992_v7 = vpop.f32.mrf.mxu1  ;;  %v449_v8 = vpop.f32.mrf.mxu0  ;;  %v520_v33 = vld [vmem:[#allocation3] sm:$0xff] }
  0xdd   :  { %338 = vst.msk [vmem:[#allocation3 + $0x20] sm:$0xff] %vm53_vm2, %v316_v4  ;;  %v331_v9 = vadd.f32 %v2992_v7, %v2731_v44  ;;  %465 = vst.msk [vmem:[#allocation4 + $0x38] sm:$0xff] %vm53_vm2, %v455_v6  ;;  %v450_v10 = vadd.f32 %v2741_v36, %v449_v8 }
  0xde   :  { %v325_v11 = vpop.f32.mrf.mxu1  ;;  %v731_v25 = vpop.f32.mrf.mxu0 }
  0xdf   :  { %341 = vst.msk [vmem:[#allocation3 + $0x38] sm:$0xff] %vm53_vm2, %v331_v9  ;;  %v326_v26 = vadd.f32 %v2731_v44, %v325_v11  ;;  %464 = vst.msk [vmem:[#allocation4 + $0x30] sm:$0xff] %vm53_vm2, %v450_v10  ;;  %v732_v43 = vadd.f32 %v3722_v41, %v731_v25  ;;  %v510_v44 = vld [vmem:[#allocation6] sm:$0xff]  ;;  %v768_v10 = vld [vmem:[#allocation2 + $0x8] sm:$0xff] }
  0xe0   :  { %v591_v28 = vpop.f32.mrf.mxu1  ;;  %v3039_v29 = vpop.f32.mrf.mxu0  ;;  %v752_v52 = vmul.f32 %v3728_v46, %v510_v44 }
  0xe1   :  { %340 = vst.msk [vmem:[#allocation3 + $0x30] sm:$0xff] %vm53_vm2, %v326_v26  ;;  %v735_v30 = vadd.f32 %v591_v28, %v519_v27 }
  0xe2   :  { %v3017_v31 = vpop.f32.mrf.mxu1  ;;  %v754_v56 = vadd.f32 %v753_v53, %v752_v52  ;;  %v1008_v53 = vmul.f32 %v3752_v58, %v3628_v20 }
  0xe3   :  { %v2760_v32 = vmul.f32 -1.442695, %v735_v30  ;;  %v770_v30 = vld [vmem:[#allocation3 + $0x8] sm:$0xff] }
  0xe4   :  { %v756_v60 = vadd.f32 %v755_v57, %v754_v56 }
  0xe5   :  { %3295 = vpow2.f32 %v2760_v32 }
  0xe6   :  { %v758_v0 = vadd.f32 %v757_v61, %v756_v60 }
  0xe8   :  { %v661_v34 = vpop.f32.mrf.mxu1  ;;  %v760_v6 = vadd.f32 %v759_v1, %v758_v0 }
  0xe9   :  { %v742_v35 = vadd.f32 %v661_v34, %v520_v33 }
  0xea   :  { %v3028_v36 = vpop.f32.mrf.mxu1 }
  0xeb   :  { %v2761_v37 = vmul.f32 -1.442695, %v742_v35 }
  0xed   :  { %3297 = vpow2.f32 %v2761_v37 }
  0xf2   :  { %v3296_v38 = vpop.eup %3295 }
  0xf3   :  { %v739_v39 = vadd.f32 1.0, %v3296_v38 }
  0xf5   :  { %3299 = vrcp.f32 %v739_v39 }
  0xfa   :  { %v3298_v40 = vpop.eup %3297 }
  0xfb   :  { %v746_v42 = vadd.f32 1.0, %v3298_v40 }
  0xfd   :  { %3301 = vrcp.f32 %v746_v42 }
 0x102   :  { %v3300_v45 = vpop.eup %3299 }
 0x103   :  { %v749_v49 = vmul.f32 %v3300_v45, %v732_v43  ;;  %v772_v43 = vld [vmem:[#allocation4 + $0x8] sm:$0xff]  ;;  %v1003_v45 = vmul.f32 %v3728_v46, %v3735_v48 }
 0x105   :  { %v750_v51 = vadd.f32 %v749_v49, %v521_v50  ;;  %v1004_v49 = vmul.f32 %v3733_v47, %v3745_v55 }
 0x107   :  { %3303 = vtanh.f32 %v750_v51  ;;  %v1005_v50 = vadd.f32 %v1004_v49, %v1003_v45  ;;  %v1006_v51 = vmul.f32 %v3743_v54, %v3754_v59 }
 0x109   :  { %v1007_v52 = vadd.f32 %v1006_v51, %v1005_v50 }
 0x10a   :  { %v3302_v63 = vpop.eup %3301 }
 0x10b   :  { %v761_v2 = vsub.f32 1.0, %v3302_v63  ;;  %v763_v4 = vmul.f32 %v3302_v63, %v3628_v20  ;;  %v1009_v60 = vadd.f32 %v1008_v53, %v1007_v52 }
 0x114   :  { %v3304_v3 = vpop.eup %3303 }
 0x115   :  { %v762_v7 = vmul.f32 %v3304_v3, %v761_v2 }
 0x117   :  { %v764_v8 = vadd.f32 %v763_v4, %v762_v7  ;;  %v1020_v4 = vld [vmem:[#allocation2 + $0x10] sm:$0xff] }
 0x119   :  { %v3766_v9 = vsub.f32 %v764_v8, %v760_v6 }
 0x11b   :  { %766 = vst.msk [vmem:[#allocation5] sm:$0xff] %vm53_vm2, %v3766_v9  ;;  %3049 = vmatmul.mubr.msk.f32.vlgmr.msra.gmra.mxu1 %vm53_vm2, %v3766_v9  ;;  %3060 = vmatmul.mubr.msk.f32.vlgmr.msra.gmra.mxu0 %vm53_vm2, %v3766_v9  ;;  %v1010_v61 = vmul.f32 %v3761_v62, %v3766_v9  ;;  %v1260_v50 = vmul.f32 %v3752_v58, %v3766_v9 }
 0x11c   :  { %3063 = vmatpush3.msra.mxu1 %v3554_v12  ;;  %3070 = vmatprep.mubr.msk.f32.mxu1 %vm3410_vm3, %v3409_v5 }
 0x11d   :  { %3064 = vmatprep.subr.mxu1 %v3409_v5  ;;  %3074 = vmatpush3.msra.mxu0 %v3569_v14  ;;  %v1011_v1 = vadd.f32 %v1010_v61, %v1009_v60 }
 0x11e   :  { %3065 = vmatpush3.msra.mxu1 %v3562_v13  ;;  %3075 = vmatprep.subr.mxu0 %v3409_v5 }
 0x11f   :  { %3066 = vmatprep.subr.mxu1 %v3409_v5  ;;  %3076 = vmatpush3.msra.mxu0 %v3578_v15 }
 0x120   :  { %3067 = vmatpush3.msra.mxu1 %v3602_v18  ;;  %3077 = vmatprep.subr.mxu0 %v3409_v5 }
 0x121   :  { %3068 = vmatprep.subr.mxu1 %v3409_v5  ;;  %3078 = vmatpush3.msra.mxu0 %v3587_v16 }
 0x122   :  { %3069 = vmatpush3.msra.mxu1 %v3615_v19  ;;  %3079 = vmatprep.subr.mxu0 %v3409_v5 }
 0x123   :  { %3071 = vmatmul.mubr.msk.f32.vlgmr.msra.gmra.mxu1 %vm53_vm2, %v3766_v9  ;;  %3084 = vmatprep.subr.mxu1 %v3409_v5 }
 0x124   :  { %3085 = vmatpush3.msra.mxu1 %v3633_v21  ;;  %3080 = vmatpush3.msra.mxu0 %v3597_v17 }
 0x125   :  { %3086 = vmatprep.subr.mxu1 %v3409_v5  ;;  %3081 = vmatprep.mubr.msk.f32.mxu0 %vm3410_vm3, %v3409_v5 }
 0x126   :  { %3087 = vmatpush3.msra.mxu1 %v3645_v22  ;;  %3092 = vmatprep.mubr.msk.f32.mxu1 %vm3410_vm3, %v3409_v5 }
 0x127   :  { %3088 = vmatprep.subr.mxu1 %v3409_v5  ;;  %3095 = vmatprep.subr.mxu0 %v3409_v5 }
 0x128   :  { %3089 = vmatpush3.msra.mxu1 %v3655_v23 }
 0x129   :  { %3090 = vmatprep.subr.mxu1 %v3409_v5 }
 0x12a   :  { %3091 = vmatpush3.msra.mxu1 %v3664_v24 }
 0x12b   :  { %3106 = vmatprep.subr.mxu1 %v3409_v5 }
 0x1db   :  { %v842_v11 = vpop.f32.mrf.mxu1  ;;  %v912_v25 = vpop.f32.mrf.mxu0 }
 0x1dc   :  { %v986_v26 = vadd.f32 %v842_v11, %v768_v10  ;;  %v993_v31 = vadd.f32 %v912_v25, %v770_v30 }
 0x1dd   :  { %v3050_v27 = vpop.f32.mrf.mxu1  ;;  %v3061_v28 = vpop.f32.mrf.mxu0 }
 0x1de   :  { %v2765_v29 = vmul.f32 -1.442695, %v986_v26  ;;  %v2766_v34 = vmul.f32 -1.442695, %v993_v31  ;;  %v1022_v26 = vld [vmem:[#allocation3 + $0x10] sm:$0xff] }
 0x1e0   :  { %3305 = vpow2.f32 %v2765_v29 }
 0x1e1   :  { %3307 = vpow2.f32 %v2766_v34 }
 0x1e3   :  { %v982_v32 = vpop.f32.mrf.mxu1 }
 0x1e4   :  { %v983_v39 = vadd.f32 %v3722_v41, %v982_v32 }
 0x1e5   :  { %v3072_v33 = vpop.f32.mrf.mxu1 }
 0x1ed   :  { %v3306_v35 = vpop.eup %3305 }
 0x1ee   :  { %v990_v36 = vadd.f32 1.0, %v3306_v35  ;;  %v3308_v37 = vpop.eup %3307 }
 0x1ef   :  { %v997_v38 = vadd.f32 1.0, %v3308_v37 }
 0x1f0   :  { %3309 = vrcp.f32 %v990_v36 }
 0x1f1   :  { %3311 = vrcp.f32 %v997_v38  ;;  %v1024_v38 = vld [vmem:[#allocation4 + $0x10] sm:$0xff] }
 0x1fd   :  { %v3310_v40 = vpop.eup %3309 }
 0x1fe   :  { %v1000_v42 = vmul.f32 %v3310_v40, %v983_v39  ;;  %v3312_v56 = vpop.eup %3311  ;;  %v1255_v40 = vmul.f32 %v3728_v46, %v3745_v55 }
 0x1ff   :  { %v1012_v57 = vsub.f32 1.0, %v3312_v56  ;;  %v1014_v48 = vmul.f32 %v3312_v56, %v3766_v9 }
 0x200   :  { %v1001_v44 = vadd.f32 %v1000_v42, %v772_v43  ;;  %v1256_v42 = vmul.f32 %v3733_v47, %v3754_v59 }
 0x202   :  { %3313 = vtanh.f32 %v1001_v44  ;;  %v1257_v43 = vadd.f32 %v1256_v42, %v1255_v40  ;;  %v1258_v44 = vmul.f32 %v3743_v54, %v3628_v20 }
 0x204   :  { %v1259_v49 = vadd.f32 %v1258_v44, %v1257_v43 }
 0x206   :  { %v1261_v55 = vadd.f32 %v1260_v50, %v1259_v49 }
 0x20f   :  { %v3314_v63 = vpop.eup %3313 }
 0x210   :  { %v1013_v0 = vmul.f32 %v3314_v63, %v1012_v57 }
 0x212   :  { %v1015_v2 = vadd.f32 %v1014_v48, %v1013_v0  ;;  %v1272_v48 = vld [vmem:[#allocation2 + $0x18] sm:$0xff] }
 0x214   :  { %v3818_v3 = vsub.f32 %v1015_v2, %v1011_v1 }
 0x216   :  { %1018 = vst.msk [vmem:[#allocation5 + $0x8] sm:$0xff] %vm53_vm2, %v3818_v3  ;;  %3082 = vmatmul.mubr.msk.f32.vlgmr.msra.gmra.mxu0 %vm53_vm2, %v3818_v3  ;;  %3093 = vmatmul.mubr.msk.f32.vlgmr.msra.gmra.mxu1 %vm53_vm2, %v3818_v3  ;;  %v1262_v52 = vmul.f32 %v3761_v62, %v3818_v3  ;;  %v1512_v42 = vmul.f32 %v3752_v58, %v3818_v3 }
 0x217   :  { %3096 = vmatpush3.msra.mxu0 %v3554_v12  ;;  %3103 = vmatprep.mubr.msk.f32.mxu0 %vm3410_vm3, %v3409_v5 }
 0x218   :  { %3097 = vmatprep.subr.mxu0 %v3409_v5  ;;  %3107 = vmatpush3.msra.mxu1 %v3569_v14  ;;  %v1263_v60 = vadd.f32 %v1262_v52, %v1261_v55 }
 0x219   :  { %3098 = vmatpush3.msra.mxu0 %v3562_v13  ;;  %3108 = vmatprep.subr.mxu1 %v3409_v5 }
 0x21a   :  { %3099 = vmatprep.subr.mxu0 %v3409_v5  ;;  %3109 = vmatpush3.msra.mxu1 %v3578_v15 }
 0x21b   :  { %3100 = vmatpush3.msra.mxu0 %v3602_v18  ;;  %3110 = vmatprep.subr.mxu1 %v3409_v5 }
 0x21c   :  { %3101 = vmatprep.subr.mxu0 %v3409_v5  ;;  %3111 = vmatpush3.msra.mxu1 %v3587_v16 }
 0x21d   :  { %3102 = vmatpush3.msra.mxu0 %v3615_v19  ;;  %3112 = vmatprep.subr.mxu1 %v3409_v5 }
 0x21e   :  { %3104 = vmatmul.mubr.msk.f32.vlgmr.msra.gmra.mxu0 %vm53_vm2, %v3818_v3  ;;  %3117 = vmatprep.subr.mxu0 %v3409_v5 }
 0x21f   :  { %3118 = vmatpush3.msra.mxu0 %v3633_v21  ;;  %3113 = vmatpush3.msra.mxu1 %v3597_v17 }
 0x220   :  { %3119 = vmatprep.subr.mxu0 %v3409_v5  ;;  %3114 = vmatprep.mubr.msk.f32.mxu1 %vm3410_vm3, %v3409_v5 }
 0x221   :  { %3120 = vmatpush3.msra.mxu0 %v3645_v22  ;;  %3125 = vmatprep.mubr.msk.f32.mxu0 %vm3410_vm3, %v3409_v5 }
 0x222   :  { %3121 = vmatprep.subr.mxu0 %v3409_v5  ;;  %3128 = vmatprep.subr.mxu1 %v3409_v5 }
 0x223   :  { %3122 = vmatpush3.msra.mxu0 %v3655_v23 }
 0x224   :  { %3123 = vmatprep.subr.mxu0 %v3409_v5 }
 0x225   :  { %3124 = vmatpush3.msra.mxu0 %v3664_v24 }
 0x226   :  { %3139 = vmatprep.subr.mxu0 %v3409_v5 }
 0x2d6   :  { %v1094_v6 = vpop.f32.mrf.mxu0  ;;  %v1164_v7 = vpop.f32.mrf.mxu1 }
 0x2d7   :  { %v1238_v8 = vadd.f32 %v1094_v6, %v1020_v4  ;;  %v1245_v27 = vadd.f32 %v1164_v7, %v1022_v26 }
 0x2d8   :  { %v3083_v10 = vpop.f32.mrf.mxu0  ;;  %v3094_v11 = vpop.f32.mrf.mxu1 }
 0x2d9   :  { %v2770_v25 = vmul.f32 -1.442695, %v1238_v8  ;;  %v2771_v30 = vmul.f32 -1.442695, %v1245_v27  ;;  %v1274_v8 = vld [vmem:[#allocation3 + $0x18] sm:$0xff] }
 0x2db   :  { %3315 = vpow2.f32 %v2770_v25 }
 0x2dc   :  { %3317 = vpow2.f32 %v2771_v30 }
 0x2de   :  { %v1234_v28 = vpop.f32.mrf.mxu0 }
 0x2df   :  { %v1235_v35 = vadd.f32 %v3722_v41, %v1234_v28 }
 0x2e0   :  { %v3105_v29 = vpop.f32.mrf.mxu0 }
 0x2e8   :  { %v3316_v31 = vpop.eup %3315 }
 0x2e9   :  { %v1242_v32 = vadd.f32 1.0, %v3316_v31  ;;  %v3318_v33 = vpop.eup %3317 }
 0x2ea   :  { %v1249_v34 = vadd.f32 1.0, %v3318_v33 }
 0x2eb   :  { %3319 = vrcp.f32 %v1242_v32 }
 0x2ec   :  { %3321 = vrcp.f32 %v1249_v34  ;;  %v1276_v34 = vld [vmem:[#allocation4 + $0x18] sm:$0xff] }
 0x2f8   :  { %v3320_v36 = vpop.eup %3319 }
 0x2f9   :  { %v1252_v37 = vmul.f32 %v3320_v36, %v1235_v35  ;;  %v3322_v45 = vpop.eup %3321  ;;  %v1507_v36 = vmul.f32 %v3728_v46, %v3754_v59 }
 0x2fa   :  { %v1264_v51 = vsub.f32 1.0, %v3322_v45  ;;  %v1266_v56 = vmul.f32 %v3322_v45, %v3818_v3 }
 0x2fb   :  { %v1253_v39 = vadd.f32 %v1252_v37, %v1024_v38  ;;  %v1508_v37 = vmul.f32 %v3733_v47, %v3628_v20 }
 0x2fd   :  { %3323 = vtanh.f32 %v1253_v39  ;;  %v1509_v38 = vadd.f32 %v1508_v37, %v1507_v36  ;;  %v1510_v39 = vmul.f32 %v3743_v54, %v3766_v9 }
 0x2ff   :  { %v1511_v44 = vadd.f32 %v1510_v39, %v1509_v38 }
 0x301   :  { %v1513_v59 = vadd.f32 %v1512_v42, %v1511_v44 }
 0x30a   :  { %v3324_v53 = vpop.eup %3323 }
 0x30b   :  { %v1265_v57 = vmul.f32 %v3324_v53, %v1264_v51 }
 0x30d   :  { %v1267_v61 = vadd.f32 %v1266_v56, %v1265_v57 }
 0x30f   :  { %v3870_v63 = vsub.f32 %v1267_v61, %v1263_v60 }
 0x311   :  { %1270 = vst.msk [vmem:[#allocation5 + $0x10] sm:$0xff] %vm53_vm2, %v3870_v63  ;;  %3115 = vmatmul.mubr.msk.f32.vlgmr.msra.gmra.mxu1 %vm53_vm2, %v3870_v63  ;;  %3126 = vmatmul.mubr.msk.f32.vlgmr.msra.gmra.mxu0 %vm53_vm2, %v3870_v63  ;;  %v1514_v45 = vmul.f32 %v3761_v62, %v3870_v63  ;;  %v1764_v36 = vmul.f32 %v3752_v58, %v3870_v63 }
 0x312   :  { %3129 = vmatpush3.msra.mxu1 %v3554_v12  ;;  %3136 = vmatprep.mubr.msk.f32.mxu1 %vm3410_vm3, %v3409_v5 }
 0x313   :  { %3130 = vmatprep.subr.mxu1 %v3409_v5  ;;  %3140 = vmatpush3.msra.mxu0 %v3569_v14  ;;  %v1515_v52 = vadd.f32 %v1514_v45, %v1513_v59  ;;  %v4003_v59 = vld [vmem:[%s4247_s6 + $0x10] sm:$0xff] }
 0x314   :  { %3131 = vmatpush3.msra.mxu1 %v3562_v13  ;;  %3141 = vmatprep.subr.mxu0 %v3409_v5 }
 0x315   :  { %3132 = vmatprep.subr.mxu1 %v3409_v5  ;;  %3142 = vmatpush3.msra.mxu0 %v3578_v15 }
 0x316   :  { %3133 = vmatpush3.msra.mxu1 %v3602_v18  ;;  %3143 = vmatprep.subr.mxu0 %v3409_v5 }
 0x317   :  { %3134 = vmatprep.subr.mxu1 %v3409_v5  ;;  %3144 = vmatpush3.msra.mxu0 %v3587_v16 }
 0x318   :  { %3135 = vmatpush3.msra.mxu1 %v3615_v19  ;;  %3145 = vmatprep.subr.mxu0 %v3409_v5 }
 0x319   :  { %3137 = vmatmul.mubr.msk.f32.vlgmr.msra.gmra.mxu1 %vm53_vm2, %v3870_v63  ;;  %3150 = vmatprep.subr.mxu1 %v3409_v5 }
 0x31a   :  { %3151 = vmatpush3.msra.mxu1 %v3633_v21  ;;  %3146 = vmatpush3.msra.mxu0 %v3597_v17 }
 0x31b   :  { %3152 = vmatprep.subr.mxu1 %v3409_v5  ;;  %3147 = vmatprep.mubr.msk.f32.mxu0 %vm3410_vm3, %v3409_v5 }
 0x31c   :  { %3153 = vmatpush3.msra.mxu1 %v3645_v22  ;;  %3158 = vmatprep.mubr.msk.f32.mxu1 %vm3410_vm3, %v3409_v5 }
 0x31d   :  { %3154 = vmatprep.subr.mxu1 %v3409_v5  ;;  %3161 = vmatprep.subr.mxu0 %v3409_v5 }
 0x31e   :  { %3155 = vmatpush3.msra.mxu1 %v3655_v23 }
 0x31f   :  { %3156 = vmatprep.subr.mxu1 %v3409_v5 }
 0x320   :  { %3157 = vmatpush3.msra.mxu1 %v3664_v24 }
 0x321   :  { %3172 = vmatprep.subr.mxu1 %v3409_v5 }
 0x3d1   :  { %v1346_v0 = vpop.f32.mrf.mxu1  ;;  %v1416_v1 = vpop.f32.mrf.mxu0 }
 0x3d2   :  { %v1490_v2 = vadd.f32 %v1346_v0, %v1272_v48  ;;  %v1497_v10 = vadd.f32 %v1416_v1, %v1274_v8  ;;  %v1526_v1 = vld [vmem:[#allocation3 + $0x20] sm:$0xff] }
 0x3d3   :  { %v3116_v4 = vpop.f32.mrf.mxu1  ;;  %v3127_v6 = vpop.f32.mrf.mxu0 }
 0x3d4   :  { %v2775_v7 = vmul.f32 -1.442695, %v1490_v2  ;;  %v2776_v26 = vmul.f32 -1.442695, %v1497_v10 }
 0x3d6   :  { %3325 = vpow2.f32 %v2775_v7 }
 0x3d7   :  { %3327 = vpow2.f32 %v2776_v26 }
 0x3d9   :  { %v1486_v11 = vpop.f32.mrf.mxu1 }
 0x3da   :  { %v1487_v31 = vadd.f32 %v3722_v41, %v1486_v11 }
 0x3db   :  { %v3138_v25 = vpop.f32.mrf.mxu1 }
 0x3e3   :  { %v3326_v27 = vpop.eup %3325 }
 0x3e4   :  { %v1494_v28 = vadd.f32 1.0, %v3326_v27  ;;  %v3328_v29 = vpop.eup %3327 }
 0x3e5   :  { %v1501_v30 = vadd.f32 1.0, %v3328_v29  ;;  %v1528_v29 = vld [vmem:[#allocation4 + $0x20] sm:$0xff] }
 0x3e6   :  { %3329 = vrcp.f32 %v1494_v28 }
 0x3e7   :  { %3331 = vrcp.f32 %v1501_v30 }
 0x3f3   :  { %v3330_v32 = vpop.eup %3329 }
 0x3f4   :  { %v1504_v33 = vmul.f32 %v3330_v32, %v1487_v31  ;;  %v3332_v40 = vpop.eup %3331  ;;  %v1759_v31 = vmul.f32 %v3728_v46, %v3628_v20  ;;  %v1760_v32 = vmul.f32 %v3733_v47, %v3766_v9 }
 0x3f5   :  { %v1516_v43 = vsub.f32 1.0, %v3332_v40  ;;  %v1518_v50 = vmul.f32 %v3332_v40, %v3870_v63 }
 0x3f6   :  { %v1505_v35 = vadd.f32 %v1504_v33, %v1276_v34  ;;  %v1762_v33 = vmul.f32 %v3743_v54, %v3818_v3 }
 0x3f8   :  { %3333 = vtanh.f32 %v1505_v35  ;;  %v1761_v35 = vadd.f32 %v1760_v32, %v1759_v31 }
 0x3fa   :  { %v1763_v38 = vadd.f32 %v1762_v33, %v1761_v35  ;;  %v3393_v33 = vld [vmem:[%s4248_s4 + $0x18] sm:$0xff]  ;;  %v4074_v35 = vld [vmem:[%s4247_s6 + $0x8] sm:$0xff] }
 0x3fc   :  { %v1765_v20 = vadd.f32 %v1764_v36, %v1763_v38  ;;  %v3396_v36 = vld [vmem:[%s4248_s4 + $0x8] sm:$0xff] }
 0x405   :  { %v3334_v49 = vpop.eup %3333 }
 0x406   :  { %v1517_v51 = vmul.f32 %v3334_v49, %v1516_v43 }
 0x408   :  { %v1519_v53 = vadd.f32 %v1518_v50, %v1517_v51  ;;  %v3993_v50 = vld [vmem:[%s4247_s6 + $0x18] sm:$0xff]  ;;  %v1778_v51 = vld [vmem:[#allocation3 + $0x28] sm:$0xff] }
 0x40a   :  { %v3922_v56 = vsub.f32 %v1519_v53, %v1515_v52 }
 0x40c   :  { %2531 = vst.msk [vmem:[#allocation6] sm:$0xff] %vm53_vm2, %v3922_v56  ;;  %1522 = vst.msk [vmem:[#allocation5 + $0x18] sm:$0xff] %vm53_vm2, %v3922_v56  ;;  %3148 = vmatmul.mubr.msk.f32.vlgmr.msra.gmra.mxu0 %vm53_vm2, %v3922_v56  ;;  %3159 = vmatmul.mubr.msk.f32.vlgmr.msra.gmra.mxu1 %vm53_vm2, %v3922_v56  ;;  %v1766_v39 = vmul.f32 %v3761_v62, %v3922_v56 }
 0x40d   :  { %3162 = vmatpush3.msra.mxu0 %v3554_v12  ;;  %3169 = vmatprep.mubr.msk.f32.mxu0 %vm3410_vm3, %v3409_v5 }
 0x40e   :  { %3163 = vmatprep.subr.mxu0 %v3409_v5  ;;  %3173 = vmatpush3.msra.mxu1 %v3569_v14  ;;  %v1767_v44 = vadd.f32 %v1766_v39, %v1765_v20  ;;  %v3398_v39 = vld [vmem:[%s4249_s5 + $0x18] sm:$0xff]  ;;  %v3401_v20 = vld [vmem:[%s4249_s5 + $0x8] sm:$0xff] }
 0x40f   :  { %3164 = vmatpush3.msra.mxu0 %v3562_v13  ;;  %3174 = vmatprep.subr.mxu1 %v3409_v5  ;;  %v1524_v13 = vld [vmem:[#allocation2 + $0x20] sm:$0xff] }
 0x410   :  { %3165 = vmatprep.subr.mxu0 %v3409_v5  ;;  %3175 = vmatpush3.msra.mxu1 %v3578_v15 }
 0x411   :  { %3166 = vmatpush3.msra.mxu0 %v3602_v18  ;;  %3176 = vmatprep.subr.mxu1 %v3409_v5 }
 0x412   :  { %3167 = vmatprep.subr.mxu0 %v3409_v5  ;;  %3177 = vmatpush3.msra.mxu1 %v3587_v16 }
 0x413   :  { %3168 = vmatpush3.msra.mxu0 %v3615_v19  ;;  %3178 = vmatprep.subr.mxu1 %v3409_v5  ;;  %v2703_v12 = vld [vmem:[#allocation6] sm:$0xff] }
 0x414   :  { %3170 = vmatmul.mubr.msk.f32.vlgmr.msra.gmra.mxu0 %vm53_vm2, %v3922_v56  ;;  %3183 = vmatprep.subr.mxu0 %v3409_v5  ;;  %2708 = vst.msk [vmem:[%s4255_s15] sm:$0xff] %vm53_vm2, %v2703_v12 }
 0x415   :  { %3184 = vmatpush3.msra.mxu0 %v3633_v21  ;;  %3179 = vmatpush3.msra.mxu1 %v3597_v17 }
 0x416   :  { %3185 = vmatprep.subr.mxu0 %v3409_v5  ;;  %3180 = vmatprep.mubr.msk.f32.mxu1 %vm3410_vm3, %v3409_v5 }
 0x417   :  { %3186 = vmatpush3.msra.mxu0 %v3645_v22  ;;  %3191 = vmatprep.mubr.msk.f32.mxu0 %vm3410_vm3, %v3409_v5 }
 0x418   :  { %3187 = vmatprep.subr.mxu0 %v3409_v5  ;;  %3194 = vmatprep.subr.mxu1 %v3409_v5 }
 0x419   :  { %3188 = vmatpush3.msra.mxu0 %v3655_v23 }
 0x41a   :  { %3189 = vmatprep.subr.mxu0 %v3409_v5 }
 0x41b   :  { %3190 = vmatpush3.msra.mxu0 %v3664_v24 }
 0x41c   :  { %3205 = vmatprep.subr.mxu0 %v3409_v5 }
 0x4cc   :  { %v1598_v55 = vpop.f32.mrf.mxu0  ;;  %v1668_v57 = vpop.f32.mrf.mxu1 }
 0x4cd   :  { %v1742_v60 = vadd.f32 %v1598_v55, %v1524_v13  ;;  %v1749_v2 = vadd.f32 %v1668_v57, %v1526_v1 }
 0x4ce   :  { %v3149_v61 = vpop.f32.mrf.mxu0  ;;  %v3160_v48 = vpop.f32.mrf.mxu1 }
 0x4cf   :  { %v2780_v0 = vmul.f32 -1.442695, %v1742_v60  ;;  %v2781_v7 = vmul.f32 -1.442695, %v1749_v2  ;;  %v2012_v2 = vmul.f32 %v3733_v47, %v3818_v3 }
 0x4d1   :  { %3335 = vpow2.f32 %v2780_v0  ;;  %v1780_v0 = vld [vmem:[#allocation4 + $0x28] sm:$0xff] }
 0x4d2   :  { %3337 = vpow2.f32 %v2781_v7 }
 0x4d4   :  { %v1738_v4 = vpop.f32.mrf.mxu0 }
 0x4d5   :  { %v1739_v26 = vadd.f32 %v3722_v41, %v1738_v4  ;;  %v2011_v4 = vmul.f32 %v3728_v46, %v3766_v9 }
 0x4d6   :  { %v3171_v6 = vpop.f32.mrf.mxu0 }
 0x4d7   :  { %v2014_v6 = vmul.f32 %v3743_v54, %v3870_v63 }
 0x4de   :  { %v3336_v8 = vpop.eup %3335 }
 0x4df   :  { %v1746_v10 = vadd.f32 1.0, %v3336_v8  ;;  %v3338_v11 = vpop.eup %3337  ;;  %v2013_v8 = vadd.f32 %v2012_v2, %v2011_v4  ;;  %v2266_v2 = vmul.f32 %v3743_v54, %v3922_v56  ;;  %v2546_v54 = vld [vmem:[%s4256_s12 + $0x10] sm:$0xff] }
 0x4e0   :  { %v1753_v25 = vadd.f32 1.0, %v3338_v11 }
 0x4e1   :  { %3339 = vrcp.f32 %v1746_v10  ;;  %v2016_v10 = vmul.f32 %v3752_v58, %v3922_v56 }
 0x4e2   :  { %3341 = vrcp.f32 %v1753_v25  ;;  %v2015_v25 = vadd.f32 %v2014_v6, %v2013_v8 }
 0x4ee   :  { %v3340_v27 = vpop.eup %3339 }
 0x4ef   :  { %v1756_v28 = vmul.f32 %v3340_v27, %v1739_v26  ;;  %v3342_v34 = vpop.eup %3341 }
 0x4f0   :  { %v1768_v37 = vsub.f32 1.0, %v3342_v34  ;;  %v1770_v42 = vmul.f32 %v3342_v34, %v3922_v56  ;;  %v3394_v34 = vld [vmem:[%s4248_s4 + $0x10] sm:$0xff] }
 0x4f1   :  { %v1757_v30 = vadd.f32 %v1756_v28, %v1528_v29  ;;  %v2017_v29 = vadd.f32 %v2016_v10, %v2015_v25 }
 0x4f3   :  { %3343 = vtanh.f32 %v1757_v30 }
 0x500   :  { %v3344_v40 = vpop.eup %3343 }
 0x501   :  { %v1769_v43 = vmul.f32 %v3344_v40, %v1768_v37  ;;  %v4085_v37 = vld [vmem:[%s4247_s6] sm:$0xff] }
 0x502   :  { %v3399_v40 = vld [vmem:[%s4248_s4] sm:$0xff] }
 0x503   :  { %v1771_v45 = vadd.f32 %v1770_v42, %v1769_v43  ;;  %v3400_v42 = vld [vmem:[%s4249_s5 + $0x10] sm:$0xff]  ;;  %v3402_v43 = vld [vmem:[%s4249_s5] sm:$0xff] }
 0x505   :  { %v3980_v49 = vsub.f32 %v1771_v45, %v1767_v44  ;;  %v2547_v44 = vld [vmem:[%s4256_s12 + $0x18] sm:$0xff]  ;;  %v2028_v45 = vld [vmem:[#allocation2 + $0x30] sm:$0xff] }
 0x507   :  { %2532 = vst.msk [vmem:[#allocation6 + $0x8] sm:$0xff] %vm53_vm2, %v3980_v49  ;;  %1774 = vst.msk [vmem:[#allocation5 + $0x20] sm:$0xff] %vm53_vm2, %v3980_v49  ;;  %3181 = vmatmul.mubr.msk.f32.vlgmr.msra.gmra.mxu1 %vm53_vm2, %v3980_v49  ;;  %3192 = vmatmul.mubr.msk.f32.vlgmr.msra.gmra.mxu0 %vm53_vm2, %v3980_v49  ;;  %v2018_v26 = vmul.f32 %v3761_v62, %v3980_v49 }
 0x508   :  { %3195 = vmatpush3.msra.mxu1 %v3993_v50  ;;  %3202 = vmatprep.mubr.msk.f32.mxu1 %vm3410_vm3, %v3409_v5 }
 0x509   :  { %3196 = vmatprep.subr.mxu1 %v3409_v5  ;;  %3206 = vmatpush3.msra.mxu0 %v3569_v14  ;;  %v2019_v31 = vadd.f32 %v2018_v26, %v2017_v29  ;;  %v2538_v29 = vld [vmem:[#allocation5 + $0x10] sm:$0xff] }
 0x50a   :  { %3197 = vmatpush3.msra.mxu1 %v4003_v59  ;;  %3207 = vmatprep.subr.mxu0 %v3409_v5 }
 0x50b   :  { %3198 = vmatprep.subr.mxu1 %v3409_v5  ;;  %3208 = vmatpush3.msra.mxu0 %v3578_v15  ;;  %v1776_v15 = vld [vmem:[#allocation2 + $0x28] sm:$0xff] }
 0x50c   :  { %3199 = vmatpush3.msra.mxu1 %v3602_v18  ;;  %3209 = vmatprep.subr.mxu0 %v3409_v5 }
 0x50d   :  { %3200 = vmatprep.subr.mxu1 %v3409_v5  ;;  %3210 = vmatpush3.msra.mxu0 %v3587_v16 }
 0x50e   :  { %3201 = vmatpush3.msra.mxu1 %v3615_v19  ;;  %3211 = vmatprep.subr.mxu0 %v3409_v5  ;;  %v2704_v14 = vld [vmem:[#allocation6 + $0x8] sm:$0xff] }
 0x50f   :  { %3203 = vmatmul.mubr.msk.f32.vlgmr.msra.gmra.mxu1 %vm53_vm2, %v3980_v49  ;;  %3216 = vmatprep.subr.mxu1 %v3409_v5  ;;  %2709 = vst.msk [vmem:[%s4255_s15 + $0x8] sm:$0xff] %vm53_vm2, %v2704_v14 }
 0x510   :  { %3217 = vmatpush3.msra.mxu1 %v3633_v21  ;;  %3212 = vmatpush3.msra.mxu0 %v3597_v17 }
 0x511   :  { %3218 = vmatprep.subr.mxu1 %v3409_v5  ;;  %3213 = vmatprep.mubr.msk.f32.mxu0 %vm3410_vm3, %v3409_v5 }
 0x512   :  { %3219 = vmatpush3.msra.mxu1 %v3645_v22  ;;  %3224 = vmatprep.mubr.msk.f32.mxu1 %vm3410_vm3, %v3409_v5 }
 0x513   :  { %3220 = vmatprep.subr.mxu1 %v3409_v5  ;;  %3227 = vmatprep.subr.mxu0 %v3409_v5 }
 0x514   :  { %3221 = vmatpush3.msra.mxu1 %v3655_v23 }
 0x515   :  { %3222 = vmatprep.subr.mxu1 %v3409_v5 }
 0x516   :  { %3223 = vmatpush3.msra.mxu1 %v3664_v24 }
 0x517   :  { %3238 = vmatprep.subr.mxu1 %v3409_v5 }
 0x5c7   :  { %v1850_v16 = vpop.f32.mrf.mxu1  ;;  %v1920_v17 = vpop.f32.mrf.mxu0 }
 0x5c8   :  { %v1994_v18 = vadd.f32 %v1850_v16, %v1776_v15  ;;  %v2001_v52 = vadd.f32 %v1920_v17, %v1778_v51 }
 0x5c9   :  { %v3182_v19 = vpop.f32.mrf.mxu1  ;;  %v3193_v21 = vpop.f32.mrf.mxu0 }
 0x5ca   :  { %v2785_v22 = vmul.f32 -1.442695, %v1994_v18  ;;  %v2786_v13 = vmul.f32 -1.442695, %v2001_v52  ;;  %v2030_v21 = vld [vmem:[#allocation3 + $0x30] sm:$0xff] }
 0x5cc   :  { %3345 = vpow2.f32 %v2785_v22 }
 0x5cd   :  { %3347 = vpow2.f32 %v2786_v13 }
 0x5cf   :  { %v1990_v53 = vpop.f32.mrf.mxu1 }
 0x5d0   :  { %v1991_v60 = vadd.f32 %v3722_v41, %v1990_v53 }
 0x5d1   :  { %v3204_v12 = vpop.f32.mrf.mxu1 }
 0x5d9   :  { %v3346_v23 = vpop.eup %3345 }
 0x5da   :  { %v1998_v55 = vadd.f32 1.0, %v3346_v23  ;;  %v3348_v24 = vpop.eup %3347 }
 0x5db   :  { %v2005_v57 = vadd.f32 1.0, %v3348_v24 }
 0x5dc   :  { %3349 = vrcp.f32 %v1998_v55 }
 0x5dd   :  { %3351 = vrcp.f32 %v2005_v57 }
 0x5e9   :  { %v3350_v61 = vpop.eup %3349 }
 0x5ea   :  { %v2008_v48 = vmul.f32 %v3350_v61, %v1991_v60  ;;  %v3352_v7 = vpop.eup %3351  ;;  %v2032_v61 = vld [vmem:[#allocation4 + $0x30] sm:$0xff] }
 0x5eb   :  { %v2020_v11 = vsub.f32 1.0, %v3352_v7  ;;  %v2022_v28 = vmul.f32 %v3352_v7, %v3980_v49 }
 0x5ec   :  { %v2009_v1 = vadd.f32 %v2008_v48, %v1780_v0  ;;  %v2264_v0 = vmul.f32 %v3733_v47, %v3870_v63 }
 0x5ee   :  { %3353 = vtanh.f32 %v2009_v1  ;;  %v2263_v1 = vmul.f32 %v3728_v46, %v3818_v3 }
 0x5f0   :  { %v2265_v6 = vadd.f32 %v2264_v0, %v2263_v1  ;;  %v3403_v1 = vld [vmem:[%s4253_s10] ss:$0 sm:$0xff] }
 0x5f2   :  { %v2267_v8 = vadd.f32 %v2266_v2, %v2265_v6 }
 0x5fb   :  { %v3354_v27 = vpop.eup %3353 }
 0x5fc   :  { %v2021_v30 = vmul.f32 %v3354_v27, %v2020_v11 }
 0x5fe   :  { %v2023_v9 = vadd.f32 %v2022_v28, %v2021_v30  ;;  %v2539_v30 = vld [vmem:[#allocation5 + $0x18] sm:$0xff] }
 0x600   :  { %v4048_v32 = vsub.f32 %v2023_v9, %v2019_v31  ;;  %v2540_v31 = vld [vmem:[#allocation5 + $0x20] sm:$0xff] }
 0x602   :  { %2533 = vst.msk [vmem:[#allocation6 + $0x10] sm:$0xff] %vm53_vm2, %v4048_v32  ;;  %2026 = vst.msk [vmem:[#allocation5 + $0x28] sm:$0xff] %vm53_vm2, %v4048_v32  ;;  %3214 = vmatmul.mubr.msk.f32.vlgmr.msra.gmra.mxu0 %vm53_vm2, %v4048_v32  ;;  %3225 = vmatmul.mubr.msk.f32.vlgmr.msra.gmra.mxu1 %vm53_vm2, %v4048_v32  ;;  %v2270_v10 = vmul.f32 %v3761_v62, %v4048_v32  ;;  %v2545_v62 = vld [vmem:[%s4256_s12 + $0x8] sm:$0xff] }
 0x603   :  { %3228 = vmatpush3.msra.mxu0 %v3993_v50  ;;  %3235 = vmatprep.mubr.msk.f32.mxu0 %vm3410_vm3, %v3409_v5 }
 0x604   :  { %3229 = vmatprep.subr.mxu0 %v3409_v5  ;;  %3239 = vmatpush3.msra.mxu1 %v3393_v33  ;;  %v2280_v33 = vld [vmem:[#allocation2 + $0x38] sm:$0xff] }
 0x605   :  { %3230 = vmatpush3.msra.mxu0 %v4003_v59  ;;  %3240 = vmatprep.subr.mxu1 %v3409_v5 }
 0x606   :  { %3231 = vmatprep.subr.mxu0 %v3409_v5  ;;  %3241 = vmatpush3.msra.mxu1 %v3394_v34 }
 0x607   :  { %3232 = vmatpush3.msra.mxu0 %v4074_v35  ;;  %3242 = vmatprep.subr.mxu1 %v3409_v5 }
 0x608   :  { %3233 = vmatprep.subr.mxu0 %v3409_v5  ;;  %3243 = vmatpush3.msra.mxu1 %v3396_v36 }
 0x609   :  { %3234 = vmatpush3.msra.mxu0 %v4085_v37  ;;  %3244 = vmatprep.subr.mxu1 %v3409_v5  ;;  %v2705_v38 = vld [vmem:[#allocation6 + $0x10] sm:$0xff] }
 0x60a   :  { %3236 = vmatmul.mubr.msk.f32.vlgmr.msra.gmra.mxu0 %vm53_vm2, %v4048_v32  ;;  %3249 = vmatprep.subr.mxu0 %v3409_v5  ;;  %2710 = vst.msk [vmem:[%s4255_s15 + $0x10] sm:$0xff] %vm53_vm2, %v2705_v38 }
 0x60b   :  { %3250 = vmatpush3.msra.mxu0 %v3398_v39  ;;  %3245 = vmatpush3.msra.mxu1 %v3399_v40  ;;  %v2282_v40 = vld [vmem:[#allocation3 + $0x38] sm:$0xff] }
 0x60c   :  { %3251 = vmatprep.subr.mxu0 %v3409_v5  ;;  %3246 = vmatprep.mubr.msk.f32.mxu1 %vm3410_vm3, %v3409_v5 }
 0x60d   :  { %3252 = vmatpush3.msra.mxu0 %v3400_v42  ;;  %3257 = vmatprep.mubr.msk.f32.mxu0 %vm3410_vm3, %v3409_v5 }
 0x60e   :  { %3253 = vmatprep.subr.mxu0 %v3409_v5  ;;  %3260 = vmatprep.subr.mxu1 %v3409_v5 }
 0x60f   :  { %3254 = vmatpush3.msra.mxu0 %v3401_v20  ;;  %v4178_v20 = vld [vmem:[%s4257_s13] ss:$0 sm:$0xff] }
 0x610   :  { %3255 = vmatprep.subr.mxu0 %v3409_v5 }
 0x611   :  { %3256 = vmatpush3.msra.mxu0 %v3402_v43 }
 0x612   :  { %3271 = vmatprep.subr.mxu0 %v2547_v44 }
 0x6c2   :  { %v2102_v14 = vpop.f32.mrf.mxu0  ;;  %v2172_v15 = vpop.f32.mrf.mxu1 }
 0x6c3   :  { %v2246_v16 = vadd.f32 %v2102_v14, %v2028_v45  ;;  %v2253_v22 = vadd.f32 %v2172_v15, %v2030_v21 }
 0x6c4   :  { %v3215_v17 = vpop.f32.mrf.mxu0  ;;  %v3226_v18 = vpop.f32.mrf.mxu1 }
 0x6c5   :  { %v2790_v19 = vmul.f32 -1.442695, %v2246_v16  ;;  %v2791_v53 = vmul.f32 -1.442695, %v2253_v22 }
 0x6c7   :  { %3355 = vpow2.f32 %v2790_v19 }
 0x6c8   :  { %3357 = vpow2.f32 %v2791_v53 }
 0x6ca   :  { %v2242_v51 = vpop.f32.mrf.mxu0 }
 0x6cb   :  { %v2243_v24 = vadd.f32 %v3722_v41, %v2242_v51  ;;  %v2268_v41 = vmul.f32 %v3752_v58, %v3980_v49  ;;  %v2536_v58 = vld [vmem:[#allocation5] sm:$0xff] }
 0x6cc   :  { %v3237_v52 = vpop.f32.mrf.mxu0 }
 0x6cd   :  { %v2269_v47 = vadd.f32 %v2268_v41, %v2267_v8 }
 0x6cf   :  { %v2271_v27 = vadd.f32 %v2270_v10, %v2269_v47  ;;  %v3404_v10 = vld [vmem:[%s4254_s11 + $0x1] ss:$0 sm:$0xff] }
 0x6d4   :  { %v3356_v12 = vpop.eup %3355 }
 0x6d5   :  { %v2250_v13 = vadd.f32 1.0, %v3356_v12  ;;  %v3358_v23 = vpop.eup %3357 }
 0x6d6   :  { %v2257_v55 = vadd.f32 1.0, %v3358_v23 }
 0x6d7   :  { %3359 = vrcp.f32 %v2250_v13 }
 0x6d8   :  { %3361 = vrcp.f32 %v2257_v55 }
 0x6e4   :  { %v3360_v57 = vpop.eup %3359 }
 0x6e5   :  { %v2260_v60 = vmul.f32 %v3360_v57, %v2243_v24  ;;  %v3362_v4 = vpop.eup %3361 }
 0x6e6   :  { %v2272_v7 = vsub.f32 1.0, %v3362_v4  ;;  %v2274_v25 = vmul.f32 %v3362_v4, %v4048_v32 }
 0x6e7   :  { %v2261_v48 = vadd.f32 %v2260_v60, %v2032_v61 }
 0x6e9   :  { %3363 = vtanh.f32 %v2261_v48 }
 0x6f6   :  { %v3364_v11 = vpop.eup %3363 }
 0x6f7   :  { %v2273_v26 = vmul.f32 %v3364_v11, %v2272_v7  ;;  %v2284_v7 = vld [vmem:[#allocation4 + $0x38] sm:$0xff]  ;;  %v2516_v11 = vmul.f32 %v3404_v10, %v3922_v56 }
 0x6f9   :  { %v2275_v46 = vadd.f32 %v2274_v25, %v2273_v26  ;;  %v3405_v25 = vld [vmem:[%s4254_s11] ss:$0 sm:$0xff]  ;;  %v3406_v26 = vld [vmem:[%s4254_s11 + $0x2] ss:$0 sm:$0xff] }
 0x6fa   :  { %v2515_v47 = vmul.f32 %v3405_v25, %v3870_v63  ;;  %v3408_v63 = vld [vmem:[%s4254_s11 + $0x4] ss:$0 sm:$0xff] }
 0x6fb   :  { %v4134_v3 = vsub.f32 %v2275_v46, %v2271_v27  ;;  %v2518_v27 = vmul.f32 %v3406_v26, %v3980_v49 }
 0x6fd   :  { %2534 = vst.msk [vmem:[#allocation6 + $0x18] sm:$0xff] %vm53_vm2, %v4134_v3  ;;  %2278 = vst.msk [vmem:[#allocation5 + $0x30] sm:$0xff] %vm53_vm2, %v4134_v3  ;;  %3247 = vmatmul.mubr.msk.f32.vlgmr.msra.gmra.mxu1 %vm53_vm2, %v4134_v3  ;;  %3258 = vmatmul.mubr.msk.f32.vlgmr.msra.gmra.mxu0 %vm53_vm2, %v4134_v3 }
 0x6fe   :  { %3261 = vmatpush3.msra.mxu1 %v3993_v50  ;;  %3272 = vmatpush3.msra.mxu0 %v2547_v44  ;;  %v2544_v50 = vld [vmem:[%s4256_s12] sm:$0xff] }
 0x6ff   :  { %3262 = vmatprep.subr.mxu1 %v3409_v5  ;;  %3273 = vmatprep.subr.mxu0 %v2546_v54 }
 0x700   :  { %3279 = vmatprep.mubr.msk.f32.mxu0 %vm53_vm2, %v2536_v58  ;;  %3263 = vmatpush3.msra.mxu1 %v4003_v59  ;;  %v2537_v59 = vld [vmem:[#allocation5 + $0x8] sm:$0xff]  ;;  %v3407_v58 = vld [vmem:[%s4254_s11 + $0x3] ss:$0 sm:$0xff] }
 0x701   :  { %3274 = vmatpush3.msra.mxu0 %v2546_v54  ;;  %3264 = vmatprep.subr.mxu1 %v3409_v5  ;;  %v2517_v54 = vadd.f32 %v2516_v11, %v2515_v47  ;;  %v2520_v56 = vmul.f32 %v3407_v58, %v4048_v32 }
 0x702   :  { %3275 = vmatprep.subr.mxu0 %v2545_v62  ;;  %3265 = vmatpush3.msra.mxu1 %v4074_v35 }
 0x703   :  { %3276 = vmatpush3.msra.mxu0 %v2545_v62  ;;  %3266 = vmatprep.subr.mxu1 %v3409_v5 }
 0x704   :  { %v2706_v28 = vld [vmem:[#allocation6 + $0x18] sm:$0xff]  ;;  %3277 = vmatprep.subr.mxu0 %v2544_v50  ;;  %3267 = vmatpush3.msra.mxu1 %v4085_v37  ;;  %v2542_v9 = vld [vmem:[#allocation5 + $0x30] sm:$0xff] }
 0x705   :  { %3268 = vmatprep.mubr.msk.f32.mxu1 %vm3410_vm3, %v3409_v5  ;;  %3278 = vmatpush3.msra.mxu0 %v2544_v50  ;;  %2711 = vst.msk [vmem:[%s4255_s15 + $0x18] sm:$0xff] %vm53_vm2, %v2706_v28  ;;  %v2541_v5 = vld [vmem:[#allocation5 + $0x28] sm:$0xff]  ;;  %v2519_v50 = vadd.f32 %v2518_v27, %v2517_v54  ;;  %v2522_v28 = vmul.f32 %v3408_v63, %v4134_v3 }
 0x706   :  { %3269 = vmatmul.mubr.msk.f32.vlgmr.msra.gmra.mxu1 %vm53_vm2, %v4134_v3  ;;  %3280 = vmatmul.mubr.msk.f32.vlgmr.msra.gmra.mxu0 %vm53_vm2, %v2537_v59 }
 0x707   :  { %3282 = vmatprep.mubr.msk.f32.mxu0 %vm53_vm2, %v2538_v29  ;;  %v2521_v49 = vadd.f32 %v2520_v56, %v2519_v50 }
 0x70a   :  { %3283 = vmatmul.mubr.msk.f32.gmra.mxu0 %vm53_vm2, %v2539_v30 }
 0x70b   :  { %3285 = vmatprep.mubr.msk.f32.mxu0 %vm53_vm2, %v2540_v31  ;;  %v2523_v31 = vadd.f32 %v2522_v28, %v2521_v49 }
 0x70e   :  { %3286 = vmatmul.mubr.msk.f32.gmra.mxu0 %vm53_vm2, %v2541_v5 }
 0x70f   :  { %3288 = vmatprep.mubr.msk.f32.mxu0 %vm53_vm2, %v2542_v9 }
 0x7bd   :  { %v2354_v34 = vpop.f32.mrf.mxu1  ;;  %v2424_v35 = vpop.f32.mrf.mxu0 }
 0x7be   :  { %v2498_v36 = vadd.f32 %v2354_v34, %v2280_v33  ;;  %v2505_v42 = vadd.f32 %v2424_v35, %v2282_v40 }
 0x7bf   :  { %v3248_v37 = vpop.f32.mrf.mxu1  ;;  %v3259_v38 = vpop.f32.mrf.mxu0 }
 0x7c0   :  { %v2795_v39 = vmul.f32 -1.442695, %v2498_v36  ;;  %v2796_v14 = vmul.f32 -1.442695, %v2505_v42 }
 0x7c2   :  { %3365 = vpow2.f32 %v2795_v39 }
 0x7c6   :  { %v2494_v43 = vpop.f32.mrf.mxu1  ;;  %v3281_v44 = vpop.f32.mrf.mxu0 }
 0x7c7   :  { %v2651_v45 = vadd.f32 %v3281_v44, %v4178_v20  ;;  %v2495_v2 = vadd.f32 %v3403_v1, %v2494_v43 }
 0x7c8   :  { %v3270_v15 = vpop.f32.mrf.mxu1  ;;  %v2645_v16 = vpop.f32.mrf.mxu0 }
 0x7c9   :  { %3367 = vtanh.f32 %v2651_v45  ;;  %v2646_v17 = vadd.f32 %v4178_v20, %v2645_v16 }
 0x7ca   :  { %v3284_v18 = vpop.f32.mrf.mxu0 }
 0x7cb   :  { %3369 = vtanh.f32 %v2646_v17  ;;  %v2661_v19 = vadd.f32 %v3284_v18, %v4178_v20 }
 0x7cc   :  { %3371 = vpow2.f32 %v2796_v14  ;;  %v2655_v21 = vpop.f32.mrf.mxu0 }
 0x7cd   :  { %3373 = vtanh.f32 %v2661_v19  ;;  %v2656_v22 = vadd.f32 %v4178_v20, %v2655_v21 }
 0x7ce   :  { %v3287_v51 = vpop.f32.mrf.mxu0 }
 0x7cf   :  { %v3366_v52 = vpop.eup %3365  ;;  %3375 = vtanh.f32 %v2656_v22  ;;  %v2671_v53 = vadd.f32 %v3287_v51, %v4178_v20 }
 0x7d0   :  { %v2502_v12 = vadd.f32 1.0, %v3366_v52  ;;  %v2665_v13 = vpop.f32.mrf.mxu0 }
 0x7d1   :  { %3377 = vtanh.f32 %v2671_v53  ;;  %v2666_v23 = vadd.f32 %v4178_v20, %v2665_v13 }
 0x7d2   :  { %3379 = vrcp.f32 %v2502_v12 }
 0x7d3   :  { %3381 = vtanh.f32 %v2666_v23 }
 0x7d6   :  { %v3368_v55 = vpop.eup %3367 }
 0x7d7   :  { %2693 = vst [vmem:[%s4258_s14 + $0x8] sm:$0xff] %v3368_v55 }
 0x7d8   :  { %v3370_v24 = vpop.eup %3369 }
 0x7d9   :  { %v3372_v57 = vpop.eup %3371  ;;  %2692 = vst [vmem:[%s4258_s14] sm:$0xff] %v3370_v24 }
 0x7da   :  { %v3374_v60 = vpop.eup %3373  ;;  %v2509_v48 = vadd.f32 1.0, %v3372_v57 }
 0x7db   :  { %2695 = vst [vmem:[%s4258_s14 + $0x18] sm:$0xff] %v3374_v60 }
 0x7dc   :  { %v3376_v61 = vpop.eup %3375  ;;  %3383 = vrcp.f32 %v2509_v48 }
 0x7dd   :  { %2694 = vst [vmem:[%s4258_s14 + $0x10] sm:$0xff] %v3376_v61 }
 0x7de   :  { %v3378_v0 = vpop.eup %3377 }
 0x7df   :  { %v3380_v4 = vpop.eup %3379  ;;  %2697 = vst [vmem:[%s4258_s14 + $0x28] sm:$0xff] %v3378_v0 }
 0x7e0   :  { %v2512_v6 = vmul.f32 %v3380_v4, %v2495_v2  ;;  %v3382_v41 = vpop.eup %3381 }
 0x7e1   :  { %2696 = vst [vmem:[%s4258_s14 + $0x20] sm:$0xff] %v3382_v41 }
 0x7e2   :  { %v2513_v8 = vadd.f32 %v2512_v6, %v2284_v7 }
 0x7e4   :  { %3385 = vtanh.f32 %v2513_v8 }
 0x7e9   :  { %v3384_v46 = vpop.eup %3383 }
 0x7ea   :  { %v2524_v62 = vsub.f32 1.0, %v3384_v46  ;;  %v2526_v29 = vmul.f32 %v3384_v46, %v4134_v3 }
 0x7f1   :  { %v3386_v59 = vpop.eup %3385 }
 0x7f2   :  { %v2525_v30 = vmul.f32 %v3386_v59, %v2524_v62 }
 0x7f4   :  { %v2527_v5 = vadd.f32 %v2526_v29, %v2525_v30 }
 0x7f6   :  { %v2528_v9 = vsub.f32 %v2527_v5, %v2523_v31 }
 0x7f8   :  { %2530 = vst.msk [vmem:[#allocation5 + $0x38] sm:$0xff] %vm53_vm2, %v2528_v9  ;;  %2535 = vst.msk [vmem:[#allocation6 + $0x20] sm:$0xff] %vm53_vm2, %v2528_v9 }
 0x7ff   :  { %v2707_v32 = vld [vmem:[#allocation6 + $0x20] sm:$0xff]  ;;  %v2543_v33 = vld [vmem:[#allocation5 + $0x38] sm:$0xff] }
 0x800   :  { %2712 = vst.msk [vmem:[%s4255_s15 + $0x20] sm:$0xff] %vm53_vm2, %v2707_v32  ;;  %3289 = vmatmul.mubr.msk.f32.gmra.mxu0 %vm53_vm2, %v2543_v33 }
 0x8c0   :  { %v3290_v34 = vpop.f32.mrf.mxu0 }
 0x8c1   :  { %v2681_v3 = vadd.f32 %v3290_v34, %v4178_v20 }
 0x8c2   :  { %v2675_v35 = vpop.f32.mrf.mxu0 }
 0x8c3   :  { %3387 = vtanh.f32 %v2681_v3  ;;  %v2676_v36 = vadd.f32 %v4178_v20, %v2675_v35 }
 0x8c5   :  { %3389 = vtanh.f32 %v2676_v36 }
 0x8d0   :  { %v3388_v37 = vpop.eup %3387 }
 0x8d1   :  { %2699 = vst [vmem:[%s4258_s14 + $0x38] sm:$0xff] %v3388_v37 }
 0x8d2   :  { %v3390_v38 = vpop.eup %3389 }
 0x8d3   :  { %2698 = vst [vmem:[%s4258_s14 + $0x30] sm:$0xff] %v3390_v38 }

</bundles_post_ra>
